<compile_context>
chip_gen: v6e
topology: v6e:2x2x1
jax: 0.10.0
libtpu: 0.0.40
codegen_flags: <defaults>
</compile_context>

<pallas_src>
import math

import jax
import jax.numpy as jnp
from jax import lax
from jax.experimental import pallas as pl
from jax.experimental.pallas import tpu as pltpu  # noqa: F401  (no TPU-specific specs needed: whole-array VMEM defaults)

# ----------------------------- configuration -------------------------------
B = 2                # batch
N = 8                # sequence length (N_nodes)
BN = B * N           # batch stacked onto sublanes -> 16 rows
HID = 32             # hidden_dim
VOCAB = 20           # vocab
NUM_LETTERS = 20     # num_letters
TOP_K = 4            # top_k (kept < N for the small test)
NUM_POS = 16         # num_positional_embeddings
NUM_LAYERS = 1       # module's num_layers -> 2 * NUM_LAYERS decoder layers
NUM_HEADS = 4
FF = 4 * HID         # 128
LAYERS = 2 * NUM_LAYERS
D_HEAD = HID // NUM_HEADS
KBN = TOP_K * BN     # neighbor-slot-stacked rows (64)
OUT_PAD = 128        # lane-dense padded output width (>= NUM_LETTERS)
NEG_INF = float(jnp.finfo(jnp.float32).min)
PAD_BIAS = -1e9      # bias on padded output lanes -> zero softmax mass
LN_EPS = 1e-6        # struct2seq Normalize uses eps=1e-6 (nn.LayerNorm default is 1e-5)


# ------------------------------- kernel ------------------------------------
def seq_model_kernel(
    kv_es_ref,   # [L, KBN, 2H]  f32   precomputed layer-invariant K|V half
    gt_ref,      # [2*KBN, BN]   bf16  rows 0:KBN = neighbor gather one-hots,
                 #                     rows KBN:  = TOP_K-tiled identity
    masks_ref,   # [KBN, 2]      f32   col0 = mask_attend, col1[:BN] = mask_V
    w_pack_ref,  # [L, H, 4H]    bf16  [W_Q | W_K_nb | W_V_nb | W_O]
    wf1_ref,     # [L, H, FF]    bf16
    wf2_ref,     # [L, FF, H]    bf16
    ln_ref,      # [L, 8, 128]   f32   rows: ln1_g, ln1_b, ln2_g, ln2_b, b_f2,
                 #                     b_f1, b_out(layer 0), spare
    wout_ref,    # [H, OUT_PAD]  bf16  (zero-padded cols)
    out_ref,     # [BN, OUT_PAD] f32
):
    f32 = jnp.float32
    bf16 = jnp.bfloat16
    inv_sqrt_d = 1.0 / math.sqrt(D_HEAD)

    # Block one-hot helpers: head-sum [H,NH] and head-expand [NH,H], built once
    # from 2-D iotas (f32: the tiny head matmuls are kept in full precision).
    r = lax.broadcasted_iota(jnp.int32, (HID, NUM_HEADS), 0)
    c = lax.broadcasted_iota(jnp.int32, (HID, NUM_HEADS), 1)
    hsum = jnp.where((r >= c * D_HEAD) & (r < (c + 1) * D_HEAD), 1.0, 0.0)
    r2 = lax.broadcasted_iota(jnp.int32, (NUM_HEADS, HID), 0)
    c2 = lax.broadcasted_iota(jnp.int32, (NUM_HEADS, HID), 1)
    hexp = jnp.where((c2 >= r2 * D_HEAD) & (c2 < (r2 + 1) * D_HEAD), 1.0, 0.0)

    gt = gt_ref[...]                    # [2*KBN, BN] bf16
    msk = masks_ref[...]                # [KBN, 2]    f32
    mask_att = msk[:, 0:1]              # [KBN, 1]
    mask_v = msk[0:BN, 1:2]             # [BN, 1]

    def blk(a, k):                      # k-th TOP_K sublane block (aligned)
        return a[k * BN:(k + 1) * BN]

    h_V = jnp.zeros((BN, HID), f32)

    for l in range(LAYERS):
        ln = ln_ref[l]                                  # [8, 128]
        ln1_g, ln1_b = ln[0:1, :HID], ln[1:2, :HID]
        ln2_g, ln2_b = ln[2:3, :HID], ln[3:4, :HID]
        b_f2 = ln[4:5, :HID]
        b_f1 = ln[5:6, :]                               # [1, FF]
        w_l = w_pack_ref[l]                             # [H, 4H] bf16

        # One stacked MXU push: gather_nodes(h_V) for every neighbor slot AND a
        # TOP_K-tiled copy of h_V (for Q), stacked on sublanes. One-hot rows ->
        # the bf16 rounding of h_V is the only precision loss here.
        gth = jnp.dot(gt, h_V.astype(bf16), preferred_element_type=f32)  # [2*KBN,H]

        # ONE fused projection: [W_Q | W_K_nb | W_V_nb | W_O] lanes. Q comes
        # from the tiled-row half, K|V from the gathered-row half; the unused
        # cross terms (and W_O lanes) are free at these shapes.
        proj = jnp.dot(gth.astype(bf16), w_l, preferred_element_type=f32)  # [2*KBN,4H]
        q_tiled = proj[KBN:, 0:HID]                                        # [KBN, H]
        # layer-invariant [h_E, h_S_nb] K/V half was precomputed in the wrapper
        kv = proj[:KBN, HID:3 * HID] + kv_es_ref[l]                        # [KBN, 2H]
        k_all = kv[:, :HID]
        v_all = kv[:, HID:]

        # Per-(node, neighbor, head) logits via the head-sum matmul (f32).
        logits = jnp.dot(q_tiled * k_all, hsum,
                         preferred_element_type=f32) * inv_sqrt_d          # [KBN, NH]
        logits = jnp.where(mask_att > 0.0, logits, NEG_INF)

        # Masked softmax over the TOP_K neighbor slots (aligned sublane blocks).
        m = blk(logits, 0)
        for k in range(1, TOP_K):
            m = jnp.maximum(m, blk(logits, k))
        m_t = jnp.concatenate([m] * TOP_K, axis=0)                         # [KBN, NH]
        e_all = jnp.exp(logits - m_t)
        denom = blk(e_all, 0)
        for k in range(1, TOP_K):
            denom = denom + blk(e_all, k)
        inv = pl.reciprocal(denom, approx=True)                            # EUP slot
        inv_t = jnp.concatenate([inv] * TOP_K, axis=0)

        # Single head-expand matmul for ALL slots, elementwise * V, then 3 adds.
        attend = mask_att * (e_all * inv_t)                                # [KBN, NH]
        a_exp = jnp.dot(attend, hexp, preferred_element_type=f32)          # [KBN, H]
        weighted = a_exp * v_all
        h_att = blk(weighted, 0)
        for k in range(1, TOP_K):
            h_att = h_att + blk(weighted, k)                               # [BN, H]

        dh = jnp.dot(h_att.astype(bf16), w_l[:, 3 * HID:],
                     preferred_element_type=f32)                           # W_O

        # residual + Normalize 1
        x = h_V + dh
        mu = jnp.mean(x, axis=-1, keepdims=True)
        xc = x - mu
        var = jnp.mean(xc * xc, axis=-1, keepdims=True)
        x = ln1_g * xc * lax.rsqrt(var + LN_EPS) + ln1_b

        # position-wise feed-forward + residual + Normalize 2
        ff = jnp.maximum(
            jnp.dot(x.astype(bf16), wf1_ref[l], preferred_element_type=f32) + b_f1,
            0.0)
        ff = jnp.dot(ff.astype(bf16), wf2_ref[l], preferred_element_type=f32) + b_f2
        y = x + ff
        mu = jnp.mean(y, axis=-1, keepdims=True)
        yc = y - mu
        var = jnp.mean(yc * yc, axis=-1, keepdims=True)
        y = ln2_g * yc * lax.rsqrt(var + LN_EPS) + ln2_b

        # node mask (mask_V)
        h_V = mask_v * y

    # output projection (lane-dense padded slab) + log_softmax over letters;
    # padded lanes carry bias PAD_BIAS so they contribute zero softmax mass.
    b_out = ln_ref[0][6:7, :]                                              # [1, OUT_PAD]
    logits_out = jnp.dot(h_V.astype(bf16), wout_ref[...],
                         preferred_element_type=f32) + b_out               # [BN, OUT_PAD]
    mx = jnp.max(logits_out, axis=-1, keepdims=True)
    lse = jnp.log(jnp.sum(jnp.exp(logits_out - mx), axis=-1, keepdims=True)) + mx
    out_ref[...] = logits_out - lse


# --------------------------- static graph glue ------------------------------
def build_static_features():
    """E_idx (batch-invariant), sinusoidal positional features, causal mask."""
    di = jnp.arange(1, TOP_K + 1)                       # [K]
    ii = jnp.arange(N)[:, None]                         # [N, 1]
    E_idx = jnp.clip(jnp.abs(ii - di[None, :]), 0, N)   # [N, K]  (== torch clamp 0..N)
    mask_att = (E_idx - ii < 0).astype(jnp.float32)     # [N, K]  autoregressive mask

    d = (E_idx - ii).astype(jnp.float32)
    freq = jnp.exp(jnp.arange(0, NUM_POS, 2, dtype=jnp.float32)
                   * (-(math.log(10000.0) / NUM_POS)))                # [P/2]
    ang = d[:, :, None] * freq[None, None, :]                         # [N, K, P/2]
    E = jnp.concatenate([jnp.cos(ang), jnp.sin(ang)], axis=-1)        # [N, K, P]
    return E_idx, E, mask_att


def make_params(key):
    def xavier(k, shape):
        fan_in, fan_out = shape[-2], shape[-1]
        limit = math.sqrt(6.0 / (fan_in + fan_out))
        return jax.random.uniform(k, shape, jnp.float32, -limit, limit)

    ks = jax.random.split(key, 12)
    return {
        "W_e": xavier(ks[0], (NUM_POS, HID)),
        "b_e": jnp.zeros((1, HID), jnp.float32),
        "W_s": xavier(ks[1], (VOCAB, HID)),
        "W_Q": xavier(ks[2], (LAYERS, HID, HID)),
        "W_K": xavier(ks[3], (LAYERS, 3 * HID, HID)),
        "W_V": xavier(ks[4], (LAYERS, 3 * HID, HID)),
        "W_O": xavier(ks[5], (LAYERS, HID, HID)),
        "ln1_g": jnp.ones((LAYERS, 1, HID), jnp.float32),
        "ln1_b": jnp.zeros((LAYERS, 1, HID), jnp.float32),
        "ln2_g": jnp.ones((LAYERS, 1, HID), jnp.float32),
        "ln2_b": jnp.zeros((LAYERS, 1, HID), jnp.float32),
        "W_f1": xavier(ks[6], (LAYERS, HID, FF)),
        "b_f1": jnp.zeros((LAYERS, 1, FF), jnp.float32),
        "W_f2": xavier(ks[7], (LAYERS, FF, HID)),
        "b_f2": jnp.zeros((LAYERS, 1, HID), jnp.float32),
        "W_out": xavier(ks[8], (HID, NUM_LETTERS)),
        "b_out": jnp.zeros((1, NUM_LETTERS), jnp.float32),
    }


# ------------------------------ wrapper -------------------------------------
def sequence_model_forward(S, L_unused, params, mask=None):
    """S: [B, N] int32 tokens.  L_unused: unused (mirrors the torch forward)."""
    del L_unused
    if mask is None:
        mask = jnp.ones((B, N), jnp.float32)
    bf16 = jnp.bfloat16
    f32 = jnp.float32

    E_idx, E_pos, mask_att = build_static_features()

    # ---- batch-invariant / token-only precompute (hoisted out of the kernel) ----
    h_E = jnp.einsum("nkp,ph->nkh", E_pos, params["W_e"]) + params["b_e"][0]   # [N, K, H]
    h_S = params["W_s"][S]                                                     # [B, N, H]
    # TODO(synk): E_idx == N (torch clamp upper bound) would be an OOB gather;
    # unreachable at N=8 / TOP_K=4, so plain advanced indexing is exact here.
    h_S_nb = h_S[:, E_idx, :]                                                  # [B, N, K, H]

    # stack all TOP_K neighbor slots onto sublanes, row order (k, b, n)
    h_E_stack = jnp.broadcast_to(jnp.transpose(h_E, (1, 0, 2))[:, None],
                                 (TOP_K, B, N, HID)).reshape(KBN, HID)
    h_S_nb_stack = jnp.transpose(h_S_nb, (2, 0, 1, 3)).reshape(KBN, HID)
    h_es = jnp.concatenate([h_E_stack, h_S_nb_stack], axis=-1)                 # [KBN, 2H] f32

    # layer-invariant half of the K/V projection, precomputed per layer (f32)
    w_kv = jnp.concatenate([params["W_K"], params["W_V"]], axis=-1)            # [L, 3H, 2H]
    w_kv_nb = w_kv[:, :HID, :]                                                 # [L, H, 2H]
    w_kv_es = w_kv[:, HID:, :]                                                 # [L, 2H, 2H]
    kv_es = jnp.einsum("rc,lcd->lrd", h_es, w_kv_es)                           # [L, KBN, 2H]

    # masks packed into one operand: col0 = mask_attend, col1[:BN] = mask_V
    mask_att_stack = jnp.broadcast_to(mask_att.T[:, None, :],
                                      (TOP_K, B, N)).reshape(KBN)
    masks = jnp.zeros((KBN, 2), f32)
    masks = masks.at[:, 0].set(mask_att_stack)
    masks = masks.at[:BN, 1].set(mask.astype(f32).reshape(BN))

    # one-hot gather rows (block-diagonal over batch) + TOP_K-tiled identity
    cols = jnp.arange(BN)
    tgt = (jnp.arange(B)[None, :, None] * N + E_idx.T[:, None, :]).reshape(KBN, 1)
    g_stack = (tgt == cols[None, :]).astype(f32)                               # [KBN, BN]
    t_stack = jnp.tile(jnp.eye(BN, dtype=f32), (TOP_K, 1))                     # [KBN, BN]
    gt_stack = jnp.concatenate([g_stack, t_stack], axis=0).astype(bf16)        # [2*KBN, BN]

    # ---- pack / fuse the per-layer weights (8 operands total) ----
    w_pack = jnp.concatenate([params["W_Q"], w_kv_nb, params["W_O"]],
                             axis=-1).astype(bf16)                             # [L, H, 4H]
    wf1 = params["W_f1"].astype(bf16)
    wf2 = params["W_f2"].astype(bf16)

    ln_pack = jnp.zeros((LAYERS, 8, 128), f32)
    ln_pack = ln_pack.at[:, 0, :HID].set(params["ln1_g"][:, 0, :])
    ln_pack = ln_pack.at[:, 1, :HID].set(params["ln1_b"][:, 0, :])
    ln_pack = ln_pack.at[:, 2, :HID].set(params["ln2_g"][:, 0, :])
    ln_pack = ln_pack.at[:, 3, :HID].set(params["ln2_b"][:, 0, :])
    ln_pack = ln_pack.at[:, 4, :HID].set(params["b_f2"][:, 0, :])
    ln_pack = ln_pack.at[:, 5, :FF].set(params["b_f1"][:, 0, :])
    b_out_row = jnp.full((OUT_PAD,), PAD_BIAS, f32).at[:NUM_LETTERS].set(
        params["b_out"][0])
    ln_pack = ln_pack.at[0, 6, :].set(b_out_row)

    w_out_pad = jnp.zeros((HID, OUT_PAD), f32).at[:, :NUM_LETTERS].set(
        params["W_out"]).astype(bf16)

    # grid=() single invocation: defaults place every operand as one whole-array
    # VMEM-resident block (total data << 1 MiB on v5e/v6e/v7x); no tiling needed.
    # TODO(synk): on v7x, grid=(B,) with dimension_semantics=("parallel",) and
    # per-batch BlockSpecs would engage the second TensorCore; kept grid=() here
    # since v5e/v6e have one TC and the per-step overhead dominates at this size.
    fn = pl.pallas_call(
        seq_model_kernel,
        out_shape=jax.ShapeDtypeStruct((BN, OUT_PAD), jnp.float32),
    )
    out_pad = fn(kv_es, gt_stack, masks, w_pack, wf1, wf2, ln_pack, w_out_pad)
    return out_pad[:, :NUM_LETTERS].reshape(B, N, NUM_LETTERS)


# -------------------------------- main --------------------------------------
if __name__ == "__main__":
    key = jax.random.PRNGKey(0)
    k_param, k_tok = jax.random.split(key)
    params = make_params(k_param)

    S = jax.random.randint(k_tok, (B, N), 0, VOCAB, dtype=jnp.int32)
    L_lengths = jnp.full((B,), N, dtype=jnp.int32)     # unused, mirrors torch signature

    log_probs = sequence_model_forward(S, L_lengths, params, mask=None)
    log_probs = jax.block_until_ready(log_probs)

    assert log_probs.shape == (B, N, NUM_LETTERS)
    assert bool(jnp.all(jnp.isfinite(log_probs)))
    # log_softmax rows must normalize
    assert bool(jnp.allclose(jnp.sum(jnp.exp(log_probs), axis=-1), 1.0, atol=1e-4))
    print("KERNEL_OK")
</pallas_src>

<mosaic_0001>
module attributes {stable_mosaic.version = 11 : i64} {
  func.func @seq_model_kernel(%arg0: memref<2x64x64xf32, #tpu.memory_space<vmem>>, %arg1: memref<128x16xbf16, #tpu.memory_space<vmem>>, %arg2: memref<64x2xf32, #tpu.memory_space<vmem>>, %arg3: memref<2x32x128xbf16, #tpu.memory_space<vmem>>, %arg4: memref<2x32x128xbf16, #tpu.memory_space<vmem>>, %arg5: memref<2x128x32xbf16, #tpu.memory_space<vmem>>, %arg6: memref<2x8x128xf32, #tpu.memory_space<vmem>>, %arg7: memref<32x128xbf16, #tpu.memory_space<vmem>>, %arg8: memref<16x128xf32, #tpu.memory_space<vmem>>) attributes {dimension_semantics = [], scalar_prefetch = 0 : i64, scratch_operands = 0 : i64, tpu.core_type = #tpu.core_type<tc>} {
    %0 = tpu.iota {dimensions = array<i32: 0>} : vector<32x4xi32>
    %1 = tpu.iota {dimensions = array<i32: 1>} : vector<32x4xi32>
    %c8_i32 = arith.constant 8 : i32
    %2 = vector.broadcast %c8_i32 : i32 to vector<32x4xi32>
    %3 = arith.muli %1, %2 : vector<32x4xi32>
    %4 = arith.cmpi sge, %0, %3 : vector<32x4xi32>
    %c1_i32 = arith.constant 1 : i32
    %5 = vector.broadcast %c1_i32 : i32 to vector<32x4xi32>
    %6 = arith.addi %1, %5 : vector<32x4xi32>
    %c8_i32_0 = arith.constant 8 : i32
    %7 = vector.broadcast %c8_i32_0 : i32 to vector<32x4xi32>
    %8 = arith.muli %6, %7 : vector<32x4xi32>
    %9 = arith.cmpi slt, %0, %8 : vector<32x4xi32>
    %10 = arith.andi %4, %9 : vector<32x4xi1>
    %cst = arith.constant 1.000000e+00 : f32
    %cst_1 = arith.constant 0.000000e+00 : f32
    %11 = vector.broadcast %cst : f32 to vector<32x4xf32>
    %12 = vector.broadcast %cst_1 : f32 to vector<32x4xf32>
    %13 = arith.select %10, %11, %12 : vector<32x4xi1>, vector<32x4xf32>
    %14 = tpu.iota {dimensions = array<i32: 0>} : vector<4x32xi32>
    %15 = tpu.iota {dimensions = array<i32: 1>} : vector<4x32xi32>
    %c8_i32_2 = arith.constant 8 : i32
    %16 = vector.broadcast %c8_i32_2 : i32 to vector<4x32xi32>
    %17 = arith.muli %14, %16 : vector<4x32xi32>
    %18 = arith.cmpi sge, %15, %17 : vector<4x32xi32>
    %c1_i32_3 = arith.constant 1 : i32
    %19 = vector.broadcast %c1_i32_3 : i32 to vector<4x32xi32>
    %20 = arith.addi %14, %19 : vector<4x32xi32>
    %c8_i32_4 = arith.constant 8 : i32
    %21 = vector.broadcast %c8_i32_4 : i32 to vector<4x32xi32>
    %22 = arith.muli %20, %21 : vector<4x32xi32>
    %23 = arith.cmpi slt, %15, %22 : vector<4x32xi32>
    %24 = arith.andi %18, %23 : vector<4x32xi1>
    %cst_5 = arith.constant 1.000000e+00 : f32
    %cst_6 = arith.constant 0.000000e+00 : f32
    %25 = vector.broadcast %cst_5 : f32 to vector<4x32xf32>
    %26 = vector.broadcast %cst_6 : f32 to vector<4x32xf32>
    %27 = arith.select %24, %25, %26 : vector<4x32xi1>, vector<4x32xf32>
    %c0 = arith.constant 0 : index
    %c0_7 = arith.constant 0 : index
    %28 = vector.load %arg1[%c0, %c0_7] : memref<128x16xbf16, #tpu.memory_space<vmem>>, vector<128x16xbf16>
    %c0_8 = arith.constant 0 : index
    %c0_9 = arith.constant 0 : index
    %29 = vector.load %arg2[%c0_8, %c0_9] : memref<64x2xf32, #tpu.memory_space<vmem>>, vector<64x2xf32>
    %30 = vector.extract_strided_slice %29 {offsets = [0, 0], sizes = [64, 1], strides = [1, 1]} : vector<64x2xf32> to vector<64x1xf32>
    %31 = vector.extract_strided_slice %29 {offsets = [0, 1], sizes = [16, 1], strides = [1, 1]} : vector<64x2xf32> to vector<16x1xf32>
    %cst_10 = arith.constant 0.000000e+00 : f32
    %32 = vector.broadcast %cst_10 : f32 to vector<16x32xf32>
    %c0_11 = arith.constant 0 : index
    %c0_12 = arith.constant 0 : index
    %c0_13 = arith.constant 0 : index
    %33 = vector.load %arg6[%c0_11, %c0_12, %c0_13] : memref<2x8x128xf32, #tpu.memory_space<vmem>>, vector<1x8x128xf32>
    %34 = vector.shape_cast %33 : vector<1x8x128xf32> to vector<8x128xf32>
    %35 = vector.extract_strided_slice %34 {offsets = [0, 0], sizes = [1, 32], strides = [1, 1]} : vector<8x128xf32> to vector<1x32xf32>
    %36 = vector.extract_strided_slice %34 {offsets = [1, 0], sizes = [1, 32], strides = [1, 1]} : vector<8x128xf32> to vector<1x32xf32>
    %37 = vector.extract_strided_slice %34 {offsets = [2, 0], sizes = [1, 32], strides = [1, 1]} : vector<8x128xf32> to vector<1x32xf32>
    %38 = vector.extract_strided_slice %34 {offsets = [3, 0], sizes = [1, 32], strides = [1, 1]} : vector<8x128xf32> to vector<1x32xf32>
    %39 = vector.extract_strided_slice %34 {offsets = [4, 0], sizes = [1, 32], strides = [1, 1]} : vector<8x128xf32> to vector<1x32xf32>
    %40 = vector.extract_strided_slice %34 {offsets = [5, 0], sizes = [1, 128], strides = [1, 1]} : vector<8x128xf32> to vector<1x128xf32>
    %c0_14 = arith.constant 0 : index
    %c0_15 = arith.constant 0 : index
    %c0_16 = arith.constant 0 : index
    %41 = vector.load %arg3[%c0_14, %c0_15, %c0_16] : memref<2x32x128xbf16, #tpu.memory_space<vmem>>, vector<1x32x128xbf16>
    %42 = vector.shape_cast %41 : vector<1x32x128xbf16> to vector<32x128xbf16>
    %43 = arith.truncf %32 : vector<16x32xf32> to vector<16x32xbf16>
    %cst_17 = arith.constant dense<0.000000e+00> : vector<128x32xf32>
    %44 = tpu.matmul %28, %43, %cst_17 {dimension_numbers = #tpu.dot_dimension_numbers<[1], [0], [0], [1], [0, 0, 1, 1], [], []>} : vector<128x16xbf16>, vector<16x32xbf16>, vector<128x32xf32> -> vector<128x32xf32>
    %45 = arith.truncf %44 : vector<128x32xf32> to vector<128x32xbf16>
    %cst_18 = arith.constant dense<0.000000e+00> : vector<128x128xf32>
    %46 = tpu.matmul %45, %42, %cst_18 {dimension_numbers = #tpu.dot_dimension_numbers<[1], [0], [0], [1], [0, 0, 1, 1], [], []>} : vector<128x32xbf16>, vector<32x128xbf16>, vector<128x128xf32> -> vector<128x128xf32>
    %47 = vector.extract_strided_slice %46 {offsets = [64, 0], sizes = [64, 32], strides = [1, 1]} : vector<128x128xf32> to vector<64x32xf32>
    %48 = vector.extract_strided_slice %46 {offsets = [0, 32], sizes = [64, 64], strides = [1, 1]} : vector<128x128xf32> to vector<64x64xf32>
    %c0_19 = arith.constant 0 : index
    %c0_20 = arith.constant 0 : index
    %c0_21 = arith.constant 0 : index
    %49 = vector.load %arg0[%c0_19, %c0_20, %c0_21] : memref<2x64x64xf32, #tpu.memory_space<vmem>>, vector<1x64x64xf32>
    %50 = vector.shape_cast %49 : vector<1x64x64xf32> to vector<64x64xf32>
    %51 = arith.addf %48, %50 : vector<64x64xf32>
    %52 = vector.extract_strided_slice %51 {offsets = [0, 0], sizes = [64, 32], strides = [1, 1]} : vector<64x64xf32> to vector<64x32xf32>
    %53 = vector.extract_strided_slice %51 {offsets = [0, 32], sizes = [64, 32], strides = [1, 1]} : vector<64x64xf32> to vector<64x32xf32>
    %54 = arith.mulf %47, %52 : vector<64x32xf32>
    %cst_22 = arith.constant dense<0.000000e+00> : vector<64x4xf32>
    %55 = tpu.matmul %54, %13, %cst_22 {dimension_numbers = #tpu.dot_dimension_numbers<[1], [0], [0], [1], [0, 0, 1, 1], [], []>} : vector<64x32xf32>, vector<32x4xf32>, vector<64x4xf32> -> vector<64x4xf32>
    %cst_23 = arith.constant 0.353553385 : f32
    %56 = vector.broadcast %cst_23 : f32 to vector<64x4xf32>
    %57 = arith.mulf %55, %56 : vector<64x4xf32>
    %cst_24 = arith.constant 0.000000e+00 : f32
    %58 = vector.broadcast %cst_24 : f32 to vector<64x1xf32>
    %59 = arith.cmpf ogt, %30, %58 : vector<64x1xf32>
    %cst_25 = arith.constant -3.40282347E+38 : f32
    %60 = vector.shape_cast %59 : vector<64x1xi1> to vector<64x1xi1>
    %61 = vector.broadcast %60 : vector<64x1xi1> to vector<64x4xi1>
    %62 = vector.broadcast %cst_25 : f32 to vector<64x4xf32>
    %63 = arith.select %61, %57, %62 : vector<64x4xi1>, vector<64x4xf32>
    %64 = vector.extract_strided_slice %63 {offsets = [0, 0], sizes = [16, 4], strides = [1, 1]} : vector<64x4xf32> to vector<16x4xf32>
    %65 = vector.extract_strided_slice %63 {offsets = [16, 0], sizes = [16, 4], strides = [1, 1]} : vector<64x4xf32> to vector<16x4xf32>
    %66 = arith.maximumf %64, %65 : vector<16x4xf32>
    %67 = vector.extract_strided_slice %63 {offsets = [32, 0], sizes = [16, 4], strides = [1, 1]} : vector<64x4xf32> to vector<16x4xf32>
    %68 = arith.maximumf %66, %67 : vector<16x4xf32>
    %69 = vector.extract_strided_slice %63 {offsets = [48, 0], sizes = [16, 4], strides = [1, 1]} : vector<64x4xf32> to vector<16x4xf32>
    %70 = arith.maximumf %68, %69 : vector<16x4xf32>
    %71 = tpu.concatenate %70, %70, %70, %70 in 0 : vector<16x4xf32>, vector<16x4xf32>, vector<16x4xf32>, vector<16x4xf32> -> vector<64x4xf32>
    %72 = arith.subf %63, %71 : vector<64x4xf32>
    %73 = math.exp %72 : vector<64x4xf32>
    %74 = vector.extract_strided_slice %73 {offsets = [0, 0], sizes = [16, 4], strides = [1, 1]} : vector<64x4xf32> to vector<16x4xf32>
    %75 = vector.extract_strided_slice %73 {offsets = [16, 0], sizes = [16, 4], strides = [1, 1]} : vector<64x4xf32> to vector<16x4xf32>
    %76 = arith.addf %74, %75 : vector<16x4xf32>
    %77 = vector.extract_strided_slice %73 {offsets = [32, 0], sizes = [16, 4], strides = [1, 1]} : vector<64x4xf32> to vector<16x4xf32>
    %78 = arith.addf %76, %77 : vector<16x4xf32>
    %79 = vector.extract_strided_slice %73 {offsets = [48, 0], sizes = [16, 4], strides = [1, 1]} : vector<64x4xf32> to vector<16x4xf32>
    %80 = arith.addf %78, %79 : vector<16x4xf32>
    %81 = tpu.reciprocal %80 {approx = true} : vector<16x4xf32> -> vector<16x4xf32>
    %82 = tpu.concatenate %81, %81, %81, %81 in 0 : vector<16x4xf32>, vector<16x4xf32>, vector<16x4xf32>, vector<16x4xf32> -> vector<64x4xf32>
    %83 = arith.mulf %73, %82 : vector<64x4xf32>
    %84 = vector.broadcast %30 : vector<64x1xf32> to vector<64x4xf32>
    %85 = arith.mulf %84, %83 : vector<64x4xf32>
    %cst_26 = arith.constant dense<0.000000e+00> : vector<64x32xf32>
    %86 = tpu.matmul %85, %27, %cst_26 {dimension_numbers = #tpu.dot_dimension_numbers<[1], [0], [0], [1], [0, 0, 1, 1], [], []>} : vector<64x4xf32>, vector<4x32xf32>, vector<64x32xf32> -> vector<64x32xf32>
    %87 = arith.mulf %86, %53 : vector<64x32xf32>
    %88 = vector.extract_strided_slice %87 {offsets = [0, 0], sizes = [16, 32], strides = [1, 1]} : vector<64x32xf32> to vector<16x32xf32>
    %89 = vector.extract_strided_slice %87 {offsets = [16, 0], sizes = [16, 32], strides = [1, 1]} : vector<64x32xf32> to vector<16x32xf32>
    %90 = arith.addf %88, %89 : vector<16x32xf32>
    %91 = vector.extract_strided_slice %87 {offsets = [32, 0], sizes = [16, 32], strides = [1, 1]} : vector<64x32xf32> to vector<16x32xf32>
    %92 = arith.addf %90, %91 : vector<16x32xf32>
    %93 = vector.extract_strided_slice %87 {offsets = [48, 0], sizes = [16, 32], strides = [1, 1]} : vector<64x32xf32> to vector<16x32xf32>
    %94 = arith.addf %92, %93 : vector<16x32xf32>
    %95 = arith.truncf %94 : vector<16x32xf32> to vector<16x32xbf16>
    %96 = vector.extract_strided_slice %42 {offsets = [0, 96], sizes = [32, 32], strides = [1, 1]} : vector<32x128xbf16> to vector<32x32xbf16>
    %cst_27 = arith.constant dense<0.000000e+00> : vector<16x32xf32>
    %97 = tpu.matmul %95, %96, %cst_27 {dimension_numbers = #tpu.dot_dimension_numbers<[1], [0], [0], [1], [0, 0, 1, 1], [], []>} : vector<16x32xbf16>, vector<32x32xbf16>, vector<16x32xf32> -> vector<16x32xf32>
    %98 = arith.addf %32, %97 : vector<16x32xf32>
    %cst_28 = arith.constant dense<0.000000e+00> : vector<16xf32>
    %99 = vector.multi_reduction <add>, %98, %cst_28 [1] : vector<16x32xf32> to vector<16xf32>
    %100 = vector.shape_cast %99 : vector<16xf32> to vector<16x1xf32>
    %cst_29 = arith.constant 3.200000e+01 : f32
    %101 = vector.broadcast %cst_29 : f32 to vector<16x1xf32>
    %102 = arith.divf %100, %101 : vector<16x1xf32>
    %103 = vector.broadcast %102 : vector<16x1xf32> to vector<16x32xf32>
    %104 = arith.subf %98, %103 : vector<16x32xf32>
    %105 = arith.mulf %104, %104 : vector<16x32xf32>
    %cst_30 = arith.constant dense<0.000000e+00> : vector<16xf32>
    %106 = vector.multi_reduction <add>, %105, %cst_30 [1] : vector<16x32xf32> to vector<16xf32>
    %107 = vector.shape_cast %106 : vector<16xf32> to vector<16x1xf32>
    %cst_31 = arith.constant 3.200000e+01 : f32
    %108 = vector.broadcast %cst_31 : f32 to vector<16x1xf32>
    %109 = arith.divf %107, %108 : vector<16x1xf32>
    %110 = vector.broadcast %35 : vector<1x32xf32> to vector<16x32xf32>
    %111 = arith.mulf %110, %104 : vector<16x32xf32>
    %cst_32 = arith.constant 9.99999997E-7 : f32
    %112 = vector.broadcast %cst_32 : f32 to vector<16x1xf32>
    %113 = arith.addf %109, %112 : vector<16x1xf32>
    %114 = math.rsqrt %113 : vector<16x1xf32>
    %115 = vector.broadcast %114 : vector<16x1xf32> to vector<16x32xf32>
    %116 = arith.mulf %111, %115 : vector<16x32xf32>
    %117 = vector.broadcast %36 : vector<1x32xf32> to vector<16x32xf32>
    %118 = arith.addf %116, %117 : vector<16x32xf32>
    %119 = arith.truncf %118 : vector<16x32xf32> to vector<16x32xbf16>
    %c0_33 = arith.constant 0 : index
    %c0_34 = arith.constant 0 : index
    %c0_35 = arith.constant 0 : index
    %120 = vector.load %arg4[%c0_33, %c0_34, %c0_35] : memref<2x32x128xbf16, #tpu.memory_space<vmem>>, vector<1x32x128xbf16>
    %121 = vector.shape_cast %120 : vector<1x32x128xbf16> to vector<32x128xbf16>
    %cst_36 = arith.constant dense<0.000000e+00> : vector<16x128xf32>
    %122 = tpu.matmul %119, %121, %cst_36 {dimension_numbers = #tpu.dot_dimension_numbers<[1], [0], [0], [1], [0, 0, 1, 1], [], []>} : vector<16x32xbf16>, vector<32x128xbf16>, vector<16x128xf32> -> vector<16x128xf32>
    %123 = vector.broadcast %40 : vector<1x128xf32> to vector<16x128xf32>
    %124 = arith.addf %122, %123 : vector<16x128xf32>
    %cst_37 = arith.constant 0.000000e+00 : f32
    %125 = vector.broadcast %cst_37 : f32 to vector<16x128xf32>
    %126 = arith.maximumf %124, %125 : vector<16x128xf32>
    %127 = arith.truncf %126 : vector<16x128xf32> to vector<16x128xbf16>
    %c0_38 = arith.constant 0 : index
    %c0_39 = arith.constant 0 : index
    %c0_40 = arith.constant 0 : index
    %128 = vector.load %arg5[%c0_38, %c0_39, %c0_40] : memref<2x128x32xbf16, #tpu.memory_space<vmem>>, vector<1x128x32xbf16>
    %129 = vector.shape_cast %128 : vector<1x128x32xbf16> to vector<128x32xbf16>
    %cst_41 = arith.constant dense<0.000000e+00> : vector<16x32xf32>
    %130 = tpu.matmul %127, %129, %cst_41 {dimension_numbers = #tpu.dot_dimension_numbers<[1], [0], [0], [1], [0, 0, 1, 1], [], []>} : vector<16x128xbf16>, vector<128x32xbf16>, vector<16x32xf32> -> vector<16x32xf32>
    %131 = vector.broadcast %39 : vector<1x32xf32> to vector<16x32xf32>
    %132 = arith.addf %130, %131 : vector<16x32xf32>
    %133 = arith.addf %118, %132 : vector<16x32xf32>
    %cst_42 = arith.constant dense<0.000000e+00> : vector<16xf32>
    %134 = vector.multi_reduction <add>, %133, %cst_42 [1] : vector<16x32xf32> to vector<16xf32>
    %135 = vector.shape_cast %134 : vector<16xf32> to vector<16x1xf32>
    %cst_43 = arith.constant 3.200000e+01 : f32
    %136 = vector.broadcast %cst_43 : f32 to vector<16x1xf32>
    %137 = arith.divf %135, %136 : vector<16x1xf32>
    %138 = vector.broadcast %137 : vector<16x1xf32> to vector<16x32xf32>
    %139 = arith.subf %133, %138 : vector<16x32xf32>
    %140 = arith.mulf %139, %139 : vector<16x32xf32>
    %cst_44 = arith.constant dense<0.000000e+00> : vector<16xf32>
    %141 = vector.multi_reduction <add>, %140, %cst_44 [1] : vector<16x32xf32> to vector<16xf32>
    %142 = vector.shape_cast %141 : vector<16xf32> to vector<16x1xf32>
    %cst_45 = arith.constant 3.200000e+01 : f32
    %143 = vector.broadcast %cst_45 : f32 to vector<16x1xf32>
    %144 = arith.divf %142, %143 : vector<16x1xf32>
    %145 = vector.broadcast %37 : vector<1x32xf32> to vector<16x32xf32>
    %146 = arith.mulf %145, %139 : vector<16x32xf32>
    %cst_46 = arith.constant 9.99999997E-7 : f32
    %147 = vector.broadcast %cst_46 : f32 to vector<16x1xf32>
    %148 = arith.addf %144, %147 : vector<16x1xf32>
    %149 = math.rsqrt %148 : vector<16x1xf32>
    %150 = vector.broadcast %149 : vector<16x1xf32> to vector<16x32xf32>
    %151 = arith.mulf %146, %150 : vector<16x32xf32>
    %152 = vector.broadcast %38 : vector<1x32xf32> to vector<16x32xf32>
    %153 = arith.addf %151, %152 : vector<16x32xf32>
    %154 = vector.broadcast %31 : vector<16x1xf32> to vector<16x32xf32>
    %155 = arith.mulf %154, %153 : vector<16x32xf32>
    %c1 = arith.constant 1 : index
    %c0_47 = arith.constant 0 : index
    %c0_48 = arith.constant 0 : index
    %156 = vector.load %arg6[%c1, %c0_47, %c0_48] : memref<2x8x128xf32, #tpu.memory_space<vmem>>, vector<1x8x128xf32>
    %157 = vector.shape_cast %156 : vector<1x8x128xf32> to vector<8x128xf32>
    %158 = vector.extract_strided_slice %157 {offsets = [0, 0], sizes = [1, 32], strides = [1, 1]} : vector<8x128xf32> to vector<1x32xf32>
    %159 = vector.extract_strided_slice %157 {offsets = [1, 0], sizes = [1, 32], strides = [1, 1]} : vector<8x128xf32> to vector<1x32xf32>
    %160 = vector.extract_strided_slice %157 {offsets = [2, 0], sizes = [1, 32], strides = [1, 1]} : vector<8x128xf32> to vector<1x32xf32>
    %161 = vector.extract_strided_slice %157 {offsets = [3, 0], sizes = [1, 32], strides = [1, 1]} : vector<8x128xf32> to vector<1x32xf32>
    %162 = vector.extract_strided_slice %157 {offsets = [4, 0], sizes = [1, 32], strides = [1, 1]} : vector<8x128xf32> to vector<1x32xf32>
    %163 = vector.extract_strided_slice %157 {offsets = [5, 0], sizes = [1, 128], strides = [1, 1]} : vector<8x128xf32> to vector<1x128xf32>
    %c1_49 = arith.constant 1 : index
    %c0_50 = arith.constant 0 : index
    %c0_51 = arith.constant 0 : index
    %164 = vector.load %arg3[%c1_49, %c0_50, %c0_51] : memref<2x32x128xbf16, #tpu.memory_space<vmem>>, vector<1x32x128xbf16>
    %165 = vector.shape_cast %164 : vector<1x32x128xbf16> to vector<32x128xbf16>
    %166 = arith.truncf %155 : vector<16x32xf32> to vector<16x32xbf16>
    %cst_52 = arith.constant dense<0.000000e+00> : vector<128x32xf32>
    %167 = tpu.matmul %28, %166, %cst_52 {dimension_numbers = #tpu.dot_dimension_numbers<[1], [0], [0], [1], [0, 0, 1, 1], [], []>} : vector<128x16xbf16>, vector<16x32xbf16>, vector<128x32xf32> -> vector<128x32xf32>
    %168 = arith.truncf %167 : vector<128x32xf32> to vector<128x32xbf16>
    %cst_53 = arith.constant dense<0.000000e+00> : vector<128x128xf32>
    %169 = tpu.matmul %168, %165, %cst_53 {dimension_numbers = #tpu.dot_dimension_numbers<[1], [0], [0], [1], [0, 0, 1, 1], [], []>} : vector<128x32xbf16>, vector<32x128xbf16>, vector<128x128xf32> -> vector<128x128xf32>
    %170 = vector.extract_strided_slice %169 {offsets = [64, 0], sizes = [64, 32], strides = [1, 1]} : vector<128x128xf32> to vector<64x32xf32>
    %171 = vector.extract_strided_slice %169 {offsets = [0, 32], sizes = [64, 64], strides = [1, 1]} : vector<128x128xf32> to vector<64x64xf32>
    %c1_54 = arith.constant 1 : index
    %c0_55 = arith.constant 0 : index
    %c0_56 = arith.constant 0 : index
    %172 = vector.load %arg0[%c1_54, %c0_55, %c0_56] : memref<2x64x64xf32, #tpu.memory_space<vmem>>, vector<1x64x64xf32>
    %173 = vector.shape_cast %172 : vector<1x64x64xf32> to vector<64x64xf32>
    %174 = arith.addf %171, %173 : vector<64x64xf32>
    %175 = vector.extract_strided_slice %174 {offsets = [0, 0], sizes = [64, 32], strides = [1, 1]} : vector<64x64xf32> to vector<64x32xf32>
    %176 = vector.extract_strided_slice %174 {offsets = [0, 32], sizes = [64, 32], strides = [1, 1]} : vector<64x64xf32> to vector<64x32xf32>
    %177 = arith.mulf %170, %175 : vector<64x32xf32>
    %cst_57 = arith.constant dense<0.000000e+00> : vector<64x4xf32>
    %178 = tpu.matmul %177, %13, %cst_57 {dimension_numbers = #tpu.dot_dimension_numbers<[1], [0], [0], [1], [0, 0, 1, 1], [], []>} : vector<64x32xf32>, vector<32x4xf32>, vector<64x4xf32> -> vector<64x4xf32>
    %cst_58 = arith.constant 0.353553385 : f32
    %179 = vector.broadcast %cst_58 : f32 to vector<64x4xf32>
    %180 = arith.mulf %178, %179 : vector<64x4xf32>
    %cst_59 = arith.constant 0.000000e+00 : f32
    %181 = vector.broadcast %cst_59 : f32 to vector<64x1xf32>
    %182 = arith.cmpf ogt, %30, %181 : vector<64x1xf32>
    %cst_60 = arith.constant -3.40282347E+38 : f32
    %183 = vector.shape_cast %182 : vector<64x1xi1> to vector<64x1xi1>
    %184 = vector.broadcast %183 : vector<64x1xi1> to vector<64x4xi1>
    %185 = vector.broadcast %cst_60 : f32 to vector<64x4xf32>
    %186 = arith.select %184, %180, %185 : vector<64x4xi1>, vector<64x4xf32>
    %187 = vector.extract_strided_slice %186 {offsets = [0, 0], sizes = [16, 4], strides = [1, 1]} : vector<64x4xf32> to vector<16x4xf32>
    %188 = vector.extract_strided_slice %186 {offsets = [16, 0], sizes = [16, 4], strides = [1, 1]} : vector<64x4xf32> to vector<16x4xf32>
    %189 = arith.maximumf %187, %188 : vector<16x4xf32>
    %190 = vector.extract_strided_slice %186 {offsets = [32, 0], sizes = [16, 4], strides = [1, 1]} : vector<64x4xf32> to vector<16x4xf32>
    %191 = arith.maximumf %189, %190 : vector<16x4xf32>
    %192 = vector.extract_strided_slice %186 {offsets = [48, 0], sizes = [16, 4], strides = [1, 1]} : vector<64x4xf32> to vector<16x4xf32>
    %193 = arith.maximumf %191, %192 : vector<16x4xf32>
    %194 = tpu.concatenate %193, %193, %193, %193 in 0 : vector<16x4xf32>, vector<16x4xf32>, vector<16x4xf32>, vector<16x4xf32> -> vector<64x4xf32>
    %195 = arith.subf %186, %194 : vector<64x4xf32>
    %196 = math.exp %195 : vector<64x4xf32>
    %197 = vector.extract_strided_slice %196 {offsets = [0, 0], sizes = [16, 4], strides = [1, 1]} : vector<64x4xf32> to vector<16x4xf32>
    %198 = vector.extract_strided_slice %196 {offsets = [16, 0], sizes = [16, 4], strides = [1, 1]} : vector<64x4xf32> to vector<16x4xf32>
    %199 = arith.addf %197, %198 : vector<16x4xf32>
    %200 = vector.extract_strided_slice %196 {offsets = [32, 0], sizes = [16, 4], strides = [1, 1]} : vector<64x4xf32> to vector<16x4xf32>
    %201 = arith.addf %199, %200 : vector<16x4xf32>
    %202 = vector.extract_strided_slice %196 {offsets = [48, 0], sizes = [16, 4], strides = [1, 1]} : vector<64x4xf32> to vector<16x4xf32>
    %203 = arith.addf %201, %202 : vector<16x4xf32>
    %204 = tpu.reciprocal %203 {approx = true} : vector<16x4xf32> -> vector<16x4xf32>
    %205 = tpu.concatenate %204, %204, %204, %204 in 0 : vector<16x4xf32>, vector<16x4xf32>, vector<16x4xf32>, vector<16x4xf32> -> vector<64x4xf32>
    %206 = arith.mulf %196, %205 : vector<64x4xf32>
    %207 = vector.broadcast %30 : vector<64x1xf32> to vector<64x4xf32>
    %208 = arith.mulf %207, %206 : vector<64x4xf32>
    %cst_61 = arith.constant dense<0.000000e+00> : vector<64x32xf32>
    %209 = tpu.matmul %208, %27, %cst_61 {dimension_numbers = #tpu.dot_dimension_numbers<[1], [0], [0], [1], [0, 0, 1, 1], [], []>} : vector<64x4xf32>, vector<4x32xf32>, vector<64x32xf32> -> vector<64x32xf32>
    %210 = arith.mulf %209, %176 : vector<64x32xf32>
    %211 = vector.extract_strided_slice %210 {offsets = [0, 0], sizes = [16, 32], strides = [1, 1]} : vector<64x32xf32> to vector<16x32xf32>
    %212 = vector.extract_strided_slice %210 {offsets = [16, 0], sizes = [16, 32], strides = [1, 1]} : vector<64x32xf32> to vector<16x32xf32>
    %213 = arith.addf %211, %212 : vector<16x32xf32>
    %214 = vector.extract_strided_slice %210 {offsets = [32, 0], sizes = [16, 32], strides = [1, 1]} : vector<64x32xf32> to vector<16x32xf32>
    %215 = arith.addf %213, %214 : vector<16x32xf32>
    %216 = vector.extract_strided_slice %210 {offsets = [48, 0], sizes = [16, 32], strides = [1, 1]} : vector<64x32xf32> to vector<16x32xf32>
    %217 = arith.addf %215, %216 : vector<16x32xf32>
    %218 = arith.truncf %217 : vector<16x32xf32> to vector<16x32xbf16>
    %219 = vector.extract_strided_slice %165 {offsets = [0, 96], sizes = [32, 32], strides = [1, 1]} : vector<32x128xbf16> to vector<32x32xbf16>
    %cst_62 = arith.constant dense<0.000000e+00> : vector<16x32xf32>
    %220 = tpu.matmul %218, %219, %cst_62 {dimension_numbers = #tpu.dot_dimension_numbers<[1], [0], [0], [1], [0, 0, 1, 1], [], []>} : vector<16x32xbf16>, vector<32x32xbf16>, vector<16x32xf32> -> vector<16x32xf32>
    %221 = arith.addf %155, %220 : vector<16x32xf32>
    %cst_63 = arith.constant dense<0.000000e+00> : vector<16xf32>
    %222 = vector.multi_reduction <add>, %221, %cst_63 [1] : vector<16x32xf32> to vector<16xf32>
    %223 = vector.shape_cast %222 : vector<16xf32> to vector<16x1xf32>
    %cst_64 = arith.constant 3.200000e+01 : f32
    %224 = vector.broadcast %cst_64 : f32 to vector<16x1xf32>
    %225 = arith.divf %223, %224 : vector<16x1xf32>
    %226 = vector.broadcast %225 : vector<16x1xf32> to vector<16x32xf32>
    %227 = arith.subf %221, %226 : vector<16x32xf32>
    %228 = arith.mulf %227, %227 : vector<16x32xf32>
    %cst_65 = arith.constant dense<0.000000e+00> : vector<16xf32>
    %229 = vector.multi_reduction <add>, %228, %cst_65 [1] : vector<16x32xf32> to vector<16xf32>
    %230 = vector.shape_cast %229 : vector<16xf32> to vector<16x1xf32>
    %cst_66 = arith.constant 3.200000e+01 : f32
    %231 = vector.broadcast %cst_66 : f32 to vector<16x1xf32>
    %232 = arith.divf %230, %231 : vector<16x1xf32>
    %233 = vector.broadcast %158 : vector<1x32xf32> to vector<16x32xf32>
    %234 = arith.mulf %233, %227 : vector<16x32xf32>
    %cst_67 = arith.constant 9.99999997E-7 : f32
    %235 = vector.broadcast %cst_67 : f32 to vector<16x1xf32>
    %236 = arith.addf %232, %235 : vector<16x1xf32>
    %237 = math.rsqrt %236 : vector<16x1xf32>
    %238 = vector.broadcast %237 : vector<16x1xf32> to vector<16x32xf32>
    %239 = arith.mulf %234, %238 : vector<16x32xf32>
    %240 = vector.broadcast %159 : vector<1x32xf32> to vector<16x32xf32>
    %241 = arith.addf %239, %240 : vector<16x32xf32>
    %242 = arith.truncf %241 : vector<16x32xf32> to vector<16x32xbf16>
    %c1_68 = arith.constant 1 : index
    %c0_69 = arith.constant 0 : index
    %c0_70 = arith.constant 0 : index
    %243 = vector.load %arg4[%c1_68, %c0_69, %c0_70] : memref<2x32x128xbf16, #tpu.memory_space<vmem>>, vector<1x32x128xbf16>
    %244 = vector.shape_cast %243 : vector<1x32x128xbf16> to vector<32x128xbf16>
    %cst_71 = arith.constant dense<0.000000e+00> : vector<16x128xf32>
    %245 = tpu.matmul %242, %244, %cst_71 {dimension_numbers = #tpu.dot_dimension_numbers<[1], [0], [0], [1], [0, 0, 1, 1], [], []>} : vector<16x32xbf16>, vector<32x128xbf16>, vector<16x128xf32> -> vector<16x128xf32>
    %246 = vector.broadcast %163 : vector<1x128xf32> to vector<16x128xf32>
    %247 = arith.addf %245, %246 : vector<16x128xf32>
    %cst_72 = arith.constant 0.000000e+00 : f32
    %248 = vector.broadcast %cst_72 : f32 to vector<16x128xf32>
    %249 = arith.maximumf %247, %248 : vector<16x128xf32>
    %250 = arith.truncf %249 : vector<16x128xf32> to vector<16x128xbf16>
    %c1_73 = arith.constant 1 : index
    %c0_74 = arith.constant 0 : index
    %c0_75 = arith.constant 0 : index
    %251 = vector.load %arg5[%c1_73, %c0_74, %c0_75] : memref<2x128x32xbf16, #tpu.memory_space<vmem>>, vector<1x128x32xbf16>
    %252 = vector.shape_cast %251 : vector<1x128x32xbf16> to vector<128x32xbf16>
    %cst_76 = arith.constant dense<0.000000e+00> : vector<16x32xf32>
    %253 = tpu.matmul %250, %252, %cst_76 {dimension_numbers = #tpu.dot_dimension_numbers<[1], [0], [0], [1], [0, 0, 1, 1], [], []>} : vector<16x128xbf16>, vector<128x32xbf16>, vector<16x32xf32> -> vector<16x32xf32>
    %254 = vector.broadcast %162 : vector<1x32xf32> to vector<16x32xf32>
    %255 = arith.addf %253, %254 : vector<16x32xf32>
    %256 = arith.addf %241, %255 : vector<16x32xf32>
    %cst_77 = arith.constant dense<0.000000e+00> : vector<16xf32>
    %257 = vector.multi_reduction <add>, %256, %cst_77 [1] : vector<16x32xf32> to vector<16xf32>
    %258 = vector.shape_cast %257 : vector<16xf32> to vector<16x1xf32>
    %cst_78 = arith.constant 3.200000e+01 : f32
    %259 = vector.broadcast %cst_78 : f32 to vector<16x1xf32>
    %260 = arith.divf %258, %259 : vector<16x1xf32>
    %261 = vector.broadcast %260 : vector<16x1xf32> to vector<16x32xf32>
    %262 = arith.subf %256, %261 : vector<16x32xf32>
    %263 = arith.mulf %262, %262 : vector<16x32xf32>
    %cst_79 = arith.constant dense<0.000000e+00> : vector<16xf32>
    %264 = vector.multi_reduction <add>, %263, %cst_79 [1] : vector<16x32xf32> to vector<16xf32>
    %265 = vector.shape_cast %264 : vector<16xf32> to vector<16x1xf32>
    %cst_80 = arith.constant 3.200000e+01 : f32
    %266 = vector.broadcast %cst_80 : f32 to vector<16x1xf32>
    %267 = arith.divf %265, %266 : vector<16x1xf32>
    %268 = vector.broadcast %160 : vector<1x32xf32> to vector<16x32xf32>
    %269 = arith.mulf %268, %262 : vector<16x32xf32>
    %cst_81 = arith.constant 9.99999997E-7 : f32
    %270 = vector.broadcast %cst_81 : f32 to vector<16x1xf32>
    %271 = arith.addf %267, %270 : vector<16x1xf32>
    %272 = math.rsqrt %271 : vector<16x1xf32>
    %273 = vector.broadcast %272 : vector<16x1xf32> to vector<16x32xf32>
    %274 = arith.mulf %269, %273 : vector<16x32xf32>
    %275 = vector.broadcast %161 : vector<1x32xf32> to vector<16x32xf32>
    %276 = arith.addf %274, %275 : vector<16x32xf32>
    %277 = vector.broadcast %31 : vector<16x1xf32> to vector<16x32xf32>
    %278 = arith.mulf %277, %276 : vector<16x32xf32>
    %c0_82 = arith.constant 0 : index
    %c0_83 = arith.constant 0 : index
    %c0_84 = arith.constant 0 : index
    %279 = vector.load %arg6[%c0_82, %c0_83, %c0_84] : memref<2x8x128xf32, #tpu.memory_space<vmem>>, vector<1x8x128xf32>
    %280 = vector.shape_cast %279 : vector<1x8x128xf32> to vector<8x128xf32>
    %281 = vector.extract_strided_slice %280 {offsets = [6, 0], sizes = [1, 128], strides = [1, 1]} : vector<8x128xf32> to vector<1x128xf32>
    %282 = arith.truncf %278 : vector<16x32xf32> to vector<16x32xbf16>
    %c0_85 = arith.constant 0 : index
    %c0_86 = arith.constant 0 : index
    %283 = vector.load %arg7[%c0_85, %c0_86] : memref<32x128xbf16, #tpu.memory_space<vmem>>, vector<32x128xbf16>
    %cst_87 = arith.constant dense<0.000000e+00> : vector<16x128xf32>
    %284 = tpu.matmul %282, %283, %cst_87 {dimension_numbers = #tpu.dot_dimension_numbers<[1], [0], [0], [1], [0, 0, 1, 1], [], []>} : vector<16x32xbf16>, vector<32x128xbf16>, vector<16x128xf32> -> vector<16x128xf32>
    %285 = vector.broadcast %281 : vector<1x128xf32> to vector<16x128xf32>
    %286 = arith.addf %284, %285 : vector<16x128xf32>
    %cst_88 = arith.constant dense<0xFF800000> : vector<16xf32>
    %287 = vector.multi_reduction <maximumf>, %286, %cst_88 [1] : vector<16x128xf32> to vector<16xf32>
    %288 = vector.shape_cast %287 : vector<16xf32> to vector<16x1xf32>
    %289 = vector.broadcast %288 : vector<16x1xf32> to vector<16x128xf32>
    %290 = arith.subf %286, %289 : vector<16x128xf32>
    %291 = math.exp %290 : vector<16x128xf32>
    %cst_89 = arith.constant dense<0.000000e+00> : vector<16xf32>
    %292 = vector.multi_reduction <add>, %291, %cst_89 [1] : vector<16x128xf32> to vector<16xf32>
    %293 = vector.shape_cast %292 : vector<16xf32> to vector<16x1xf32>
    %294 = math.log %293 : vector<16x1xf32>
    %295 = arith.addf %294, %288 : vector<16x1xf32>
    %296 = vector.broadcast %295 : vector<16x1xf32> to vector<16x128xf32>
    %297 = arith.subf %286, %296 : vector<16x128xf32>
    %c0_90 = arith.constant 0 : index
    %c0_91 = arith.constant 0 : index
    %298 = vector.load %arg8[%c0_90, %c0_91] : memref<16x128xf32, #tpu.memory_space<vmem>>, vector<16x128xf32>
    tpu.vector_store %arg8[%c0_90, %c0_91], %297 {strides = array<i32>} : memref<16x128xf32, #tpu.memory_space<vmem>>, vector<16x128xf32>,
    return
  }
}

</mosaic_0001>

<bundles_post_ra>
// kernel: tpu_custom_call.1
= control target key start
LH: loop header
LB: loop body
LE: loop exit
PB: predicated region body
PF: predicated region fallthrough
CT: control target
= control target key end

     0   :  { %v3006_v1 = vmov 0   ;;  %vm133_vm0 = vcmask 130048   ;;  %s3749_s0 = inlined_call_operand.vmem [shape: f32[2,64,64], index: 0, kind: input, shape index: {}]   ;;  %s3750_s1 = inlined_call_operand.vmem [shape: bf16[128,16], index: 1, kind: input, shape index: {}]   ;;  %s3751_s2 = inlined_call_operand.vmem [shape: f32[64,2], index: 2, kind: input, shape index: {}]   ;;  %s3752_s3 = inlined_call_operand.vmem [shape: bf16[2,32,128], index: 3, kind: input, shape index: {}]   ;;  %s3753_s4 = inlined_call_operand.vmem [shape: bf16[2,32,128], index: 4, kind: input, shape index: {}]   ;;  %s3754_s5 = inlined_call_operand.vmem [shape: bf16[2,128,32], index: 5, kind: input, shape index: {}]   ;;  %s3755_s6 = inlined_call_operand.vmem [shape: f32[2,8,128], index: 6, kind: input, shape index: {}]   ;;  %s3756_s7 = inlined_call_operand.vmem [shape: bf16[32,128], index: 7, kind: input, shape index: {}]   ;;  %s3757_s8 = inlined_call_operand.hbm [shape: f32[16,128], index: 8, kind: output, shape index: {}]  }
   0x1   :  { %v2877_v0 = vld [vmem:[%s3750_s1] sm:$0xff]   ;;  %2638 = vmatprep.subr.bf16.mxu0 %v3006_v1  ;;  %v2878_v2 = vld [vmem:[%s3750_s1 + $0x8] sm:$0xff]   ;;  %2873 = vset.pattern.permute.xlu0 %v3006_v1  ;;  %v2879_v3 = vld [vmem:[%s3750_s1 + $0x10] sm:$0xff]  }
   0x2   :  { %2639 = vmatpush3.bf16.msra.mxu0 %v3006_v1  ;;  %2640 = vmatprep.mubr.msk.bf16.mxu0 %vm133_vm0, %v2877_v0  ;;  %v2880_v4 = vld [vmem:[%s3750_s1 + $0x18] sm:$0xff]   ;;  %v2881_v5 = vld [vmem:[%s3750_s1 + $0x20] sm:$0xff]   ;;  %v2882_v6 = vld [vmem:[%s3750_s1 + $0x28] sm:$0xff]  }
   0x3   :  { %2874 = vset.pattern.permute.xlu1 %v3006_v1  ;;  %v2883_v7 = vld [vmem:[%s3750_s1 + $0x30] sm:$0xff]   ;;  %v2884_v8 = vld [vmem:[%s3750_s1 + $0x38] sm:$0xff]  }
   0x5   :  { %2641 = vmatmul.mubr.msk.bf16.vlgmr.msra.gmra.mxu0 %vm133_vm0, %v2878_v2 }
   0x6   :  { %2644 = vmatprep.mubr.msk.bf16.mxu0 %vm133_vm0, %v2879_v3 }
   0xd   :  { %2645 = vmatmul.mubr.msk.bf16.gmra.mxu0 %vm133_vm0, %v2880_v4 }
   0xe   :  { %2648 = vmatprep.mubr.msk.bf16.mxu0 %vm133_vm0, %v2881_v5 }
  0x15   :  { %2649 = vmatmul.mubr.msk.bf16.gmra.mxu0 %vm133_vm0, %v2882_v6 }
  0x16   :  { %2652 = vmatprep.mubr.msk.bf16.mxu0 %vm133_vm0, %v2883_v7 }
  0x17   :  { %13 = vsyncpa [#allocation3], 0  ;;  %v3101_v9 = vld [vmem:[%s3752_s3 + $0x8] sm:$0xff]   ;;  %v3108_v10 = vld [vmem:[%s3752_s3] sm:$0xff]   ;;  %s3007_s29 = smov 32   ;;  %vm275_vm1 = vcmask 261120   ;;  %v31_v43 = vlaneseq }
  0x18   :  { %2656 = vmatprep.subr.bf16.mxu1 %v3101_v9  ;;  %v397_v11 = vld [vmem:[%s3749_s0] sm:$0xff]  ;;  %v399_v12 = vld [vmem:[%s3749_s0 + $0x10] sm:$0xff]  ;;  %v398_v13 = vld [vmem:[%s3749_s0 + $0x8] sm:$0xff]  ;;  %v3008_v53 = vmov 1.0   ;;  %s3009_s20 = smov 96  }
  0x19   :  { %2657 = vmatpush3.bf16.msra.mxu1 %v3101_v9  ;;  %413 = vrot.lane.b32.xlu0 %v397_v11, %s3007_s29  ;;  %v400_v14 = vld [vmem:[%s3749_s0 + $0x18] sm:$0xff]  ;;  %v401_v15 = vld [vmem:[%s3749_s0 + $0x20] sm:$0xff]  ;;  %v402_v16 = vld [vmem:[%s3749_s0 + $0x28] sm:$0xff]  ;;  %v3152_v44 = vshrl.u32 %v31_v43, 7  ;;  %v3154_v45 = vand.u32 127, %v31_v43 }
  0x1a   :  { %2658 = vmatprep.subr.bf16.mxu1 %v3108_v10  ;;  %417 = vrot.lane.b32.xlu1 %v399_v12, %s3007_s29  ;;  %v403_v17 = vld [vmem:[%s3749_s0 + $0x30] sm:$0xff]  ;;  %v404_v18 = vld [vmem:[%s3749_s0 + $0x38] sm:$0xff]  ;;  %v2979_v54 = vld [vmem:[%s3750_s1 + $0x20] sm:$0xff]  }
  0x1b   :  { %v35_v46 = vadd.s32 24, %v3152_v44  ;;  %v38_v47 = vmul.u32 8, %v3154_v45  ;;  %v43_v48 = vadd.s32 1, %v3154_v45  ;;  %v34_v49 = vadd.s32 16, %v3152_v44  ;;  %v2978_v52 = vld [vmem:[%s3750_s1 + $0x18] sm:$0xff]   ;;  %v2980_v55 = vld [vmem:[%s3750_s1 + $0x28] sm:$0xff]  }
  0x1c   :  { %v33_v50 = vadd.s32 8, %v3152_v44  ;;  %v2982_v56 = vld [vmem:[%s3750_s1 + $0x38] sm:$0xff]  }
  0x1d   :  { %2653 = vmatmul.mubr.msk.bf16.gmra.mxu0 %vm133_vm0, %v2884_v8  ;;  %2659 = vmatpush3.bf16.msra.mxu1 %v3108_v10  ;;  %vm42_vm2 = vcmp.ge.s32.totalorder %v35_v46, %v38_v47  ;;  %v44_v51 = vmul.u32 8, %v43_v48  ;;  %vm41_vm3 = vcmp.ge.s32.totalorder %v34_v49, %v38_v47  ;;  %vm39_vm11 = vcmp.ge.s32.totalorder %v3152_v44, %v38_v47 }
  0x1e   :  { %415 = vrot.lane.b32.xlu0 %v398_v13, %s3007_s29  ;;  %419 = vrot.lane.b32.xlu1 %v400_v14, %s3007_s29  ;;  %vm40_vm6 = vcmp.ge.s32.totalorder %v33_v50, %v38_v47 }
  0x1f   :  { %vm48_vm4 = vcmp.lt.s32.totalorder %v35_v46, %v44_v51  ;;  %vm47_vm5 = vcmp.lt.s32.totalorder %v34_v49, %v44_v51  ;;  %vm46_vm7 = vcmp.lt.s32.totalorder %v33_v50, %v44_v51  ;;  %vm45_vm12 = vcmp.lt.s32.totalorder %v3152_v44, %v44_v51 }
  0x20   :  { %vm3161_vm8 = vmand %vm42_vm2, %vm48_vm4 }
  0x21   :  { %2676 = vmatprep.subr.msk.mxu0 %vm3161_vm8, %v3008_v53  ;;  %vm3168_vm9 = vmand %vm41_vm3, %vm47_vm5 }
  0x22   :  { %421 = vrot.lane.b32.xlu0 %v401_v15, %s3007_s29  ;;  %423 = vrot.lane.b32.xlu1 %v402_v16, %s3007_s29  ;;  %vm3175_vm10 = vmand %vm40_vm6, %vm46_vm7  ;;  %v3215_v15 = vld [vmem:[%s3751_s2] sm:$0xff] }
  0x23   :  { %2677 = vmatpush3.msk.msra.mxu0 %vm3161_vm8, %v3008_v53  ;;  %vm3193_vm13 = vmand %vm39_vm11, %vm45_vm12  ;;  %vm622_vm14 = vcmp.gt.f32.partialorder %v3215_v15, 0.0 }
  0x24   :  { %2678 = vmatprep.subr.msk.mxu0 %vm3168_vm9, %v3008_v53 }
  0x25   :  { %2679 = vmatpush3.msk.msra.mxu0 %vm3168_vm9, %v3008_v53 }
  0x26   :  { %425 = vrot.lane.b32.xlu0 %v403_v17, %s3007_s29  ;;  %427 = vrot.lane.b32.xlu1 %v404_v18, %s3007_s29 }
  0x27   :  { %2680 = vmatprep.subr.msk.mxu0 %vm3175_vm10, %v3008_v53 }
  0x28   :  { %2681 = vmatpush3.msk.msra.mxu0 %vm3175_vm10, %v3008_v53 }
  0x29   :  { %2682 = vmatprep.subr.msk.mxu0 %vm3193_vm13, %v3008_v53 }
  0x2a   :  { %2683 = vmatpush3.msk.msra.mxu0 %vm3193_vm13, %v3008_v53 }
  0x8b   :  { %v414_v57 = vpop.permute.xlu0 %413 }
  0x8c   :  { %v418_v58 = vpop.permute.xlu1 %417 }
  0x90   :  { %v416_v59 = vpop.permute.xlu0 %415  ;;  %v420_v63 = vpop.permute.xlu1 %419 }
  0x94   :  { %v422_v2 = vpop.permute.xlu0 %421  ;;  %v424_v7 = vpop.permute.xlu1 %423 }
  0x98   :  { %v426_v13 = vpop.permute.xlu0 %425 }
  0xc5   :  { %v2642_v19 = vpop.f32.mrf.mxu0 }
  0xc7   :  { %v192_v20 = vpop.f32.mrf.mxu0 }
  0xc9   :  { %v2643_v21 = vpop.f32.mrf.mxu0 }
  0xca   :  { %v256_v24 = vpack.c.bf16 %v2643_v21, %v2642_v19  ;;  %v428_v19 = vpop.permute.xlu1 %427  ;;  %v82_v21 = vld [vmem:[%s3751_s2 + $0x10] sm:$0xff] }
  0xcb   :  { %v195_v22 = vpop.f32.mrf.mxu0  ;;  %vm624_vm2 = vcmp.gt.f32.partialorder %v82_v21, 0.0 }
  0xcc   :  { %v255_v23 = vpack.c.bf16 %v195_v22, %v192_v20  ;;  %v83_v20 = vld [vmem:[%s3751_s2 + $0x18] sm:$0xff]  ;;  %v630_v22 = vsel %vm622_vm14, 1, %v3006_v1  ;;  %vm797_vm14 = vcmask 1043456  }
  0xcd   :  { %v2646_v25 = vpop.f32.mrf.mxu0  ;;  %vm625_vm15 = vcmp.gt.f32.partialorder %v83_v20, 0.0 }
  0xce   :  { %2660 = vmatprep.mubr.msk.bf16.mxu1 %vm275_vm1, %v255_v23 }
  0xcf   :  { %v208_v26 = vpop.f32.mrf.mxu0  ;;  %2661 = vmatmul.mubr.msk.bf16.vlgmr.msra.gmra.mxu1 %vm275_vm1, %v256_v24  ;;  %v85_v24 = vld [vmem:[%s3751_s2 + $0x28] sm:$0xff] }
  0xd0   :  { %vm627_vm3 = vcmp.gt.f32.partialorder %v85_v24, 0.0 }
  0xd1   :  { %v2647_v27 = vpop.f32.mrf.mxu0 }
  0xd2   :  { %v258_v30 = vpack.c.bf16 %v2647_v27, %v2646_v25  ;;  %v3235_v25 = vld [vmem:[%s3751_s2 + $0x8] sm:$0xff]  ;;  %v632_v27 = vsel %vm624_vm2, 1, %v3006_v1 }
  0xd3   :  { %v211_v28 = vpop.f32.mrf.mxu0  ;;  %vm623_vm4 = vcmp.gt.f32.partialorder %v3235_v25, 0.0 }
  0xd4   :  { %v257_v29 = vpack.c.bf16 %v211_v28, %v208_v26  ;;  %v633_v26 = vsel %vm625_vm15, 1, %v3006_v1  ;;  %v87_v28 = vld [vmem:[%s3751_s2 + $0x38] sm:$0xff] }
  0xd5   :  { %v2650_v31 = vpop.f32.mrf.mxu0  ;;  %vm629_vm5 = vcmp.gt.f32.partialorder %v87_v28, 0.0 }
  0xd6   :  { %2664 = vmatprep.mubr.msk.bf16.mxu1 %vm275_vm1, %v257_v29  ;;  %v84_v29 = vld [vmem:[%s3751_s2 + $0x20] sm:$0xff] }
  0xd7   :  { %2665 = vmatmul.mubr.msk.bf16.gmra.mxu1 %vm275_vm1, %v258_v30  ;;  %v224_v32 = vpop.f32.mrf.mxu0  ;;  %v635_v30 = vsel %vm627_vm3, 1, %v3006_v1  ;;  %vm626_vm6 = vcmp.gt.f32.partialorder %v84_v29, 0.0 }
  0xd9   :  { %v2651_v33 = vpop.f32.mrf.mxu0 }
  0xda   :  { %v260_v34 = vpack.c.bf16 %v2651_v33, %v2650_v31  ;;  %v631_v31 = vsel %vm623_vm4, 1, %v3006_v1  ;;  %v637_v33 = vsel %vm629_vm5, 1, %v3006_v1 }
  0xdb   :  { %v227_v35 = vpop.f32.mrf.mxu0 }
  0xdc   :  { %v259_v36 = vpack.c.bf16 %v227_v35, %v224_v32  ;;  %v86_v32 = vld [vmem:[%s3751_s2 + $0x30] sm:$0xff]  ;;  %s3010_s2 = smov 64  }
  0xdd   :  { %v2654_v37 = vpop.f32.mrf.mxu0  ;;  %vm628_vm7 = vcmp.gt.f32.partialorder %v86_v32, 0.0 }
  0xde   :  { %2668 = vmatprep.mubr.msk.bf16.mxu1 %vm275_vm1, %v259_v36  ;;  %v636_v35 = vsel %vm628_vm7, 1, %v3006_v1 }
  0xdf   :  { %v240_v38 = vpop.f32.mrf.mxu0  ;;  %2669 = vmatmul.mubr.msk.bf16.gmra.mxu1 %vm275_vm1, %v260_v34  ;;  %v634_v34 = vsel %vm626_vm6, 1, %v3006_v1 }
  0xe1   :  { %v2655_v39 = vpop.f32.mrf.mxu0 }
  0xe2   :  { %v262_v40 = vpack.c.bf16 %v2655_v39, %v2654_v37 }
  0xe3   :  { %v243_v41 = vpop.f32.mrf.mxu0 }
  0xe4   :  { %v261_v42 = vpack.c.bf16 %v243_v41, %v240_v38 }
  0xe6   :  { %2672 = vmatprep.mubr.msk.bf16.mxu1 %vm275_vm1, %v261_v42 }
  0xe7   :  { %2673 = vmatmul.mubr.msk.bf16.gmra.mxu1 %vm275_vm1, %v262_v40 }
 0x18f   :  { %v2662_v60 = vpop.f32.mrf.mxu1 }
 0x190   :  { %v3207_v4 = vadd.f32 %v2662_v60, %v418_v58 }
 0x191   :  { %v334_v61 = vpop.f32.mrf.mxu1 }
 0x192   :  { %v3203_v62 = vadd.f32 %v414_v57, %v334_v61 }
 0x193   :  { %v2663_v0 = vpop.f32.mrf.mxu1 }
 0x194   :  { %453 = vrot.lane.b32.xlu0 %v3203_v62, %s3009_s20  ;;  %v440_v11 = vadd.f32 %v2663_v0, %v420_v63  ;;  %v57_v0 = vmul.u32 8, %v3152_v44 }
 0x195   :  { %v337_v3 = vpop.f32.mrf.mxu1 }
 0x196   :  { %v438_v5 = vadd.f32 %v416_v59, %v337_v3  ;;  %v3011_v3 = vmov 0.0   ;;  %vm58_vm11 = vcmp.ge.s32.totalorder %v3154_v45, %v57_v0 }
 0x197   :  { %v2666_v6 = vpop.f32.mrf.mxu1  ;;  %2726 = vmatprep.subr.bf16.mxu0 %v3011_v3 }
 0x198   :  { %457 = vrot.lane.b32.xlu0 %v3207_v4, %s3009_s20  ;;  %455 = vrot.lane.b32.xlu1 %v438_v5, %s3009_s20  ;;  %v443_v17 = vadd.f32 %v2666_v6, %v426_v13 }
 0x199   :  { %v350_v8 = vpop.f32.mrf.mxu1 }
 0x19a   :  { %v441_v12 = vadd.f32 %v422_v2, %v350_v8  ;;  %v59_v2 = vadd.s32 1, %v3152_v44 }
 0x19b   :  { %v2667_v14 = vpop.f32.mrf.mxu1 }
 0x19c   :  { %459 = vrot.lane.b32.xlu1 %v440_v11, %s3009_s20  ;;  %461 = vrot.lane.b32.xlu0 %v441_v12, %s3009_s20  ;;  %v444_v23 = vadd.f32 %v2667_v14, %v428_v19 }
 0x19d   :  { %v353_v16 = vpop.f32.mrf.mxu1 }
 0x19e   :  { %v442_v18 = vadd.f32 %v424_v7, %v353_v16 }
 0x19f   :  { %v2670_v1 = vpop.f32.mrf.mxu1 }
 0x1a0   :  { %465 = vrot.lane.b32.xlu0 %v443_v17, %s3009_s20  ;;  %463 = vrot.lane.b32.xlu1 %v442_v18, %s3009_s20 }
 0x1a1   :  { %v366_v36 = vpop.f32.mrf.mxu1 }
 0x1a3   :  { %v2671_v37 = vpop.f32.mrf.mxu1 }
 0x1a4   :  { %639 = vperm.xlu0 %2873, %v630_v22   ;;  %467 = vrot.lane.b32.xlu1 %v444_v23, %s3009_s20 }
 0x1a5   :  { %v369_v38 = vpop.f32.mrf.mxu1 }
 0x1a7   :  { %v2674_v39 = vpop.f32.mrf.mxu1 }
 0x1a8   :  { %648 = vperm.xlu0 %2873, %v633_v26   ;;  %645 = vperm.xlu1 %2874, %v632_v27  }
 0x1a9   :  { %v382_v42 = vpop.f32.mrf.mxu1 }
 0x1ac   :  { %654 = vperm.xlu0 %2873, %v635_v30   ;;  %642 = vperm.xlu1 %2874, %v631_v31  }
 0x1b0   :  { %660 = vperm.xlu0 %2873, %v637_v33   ;;  %651 = vperm.xlu1 %2874, %v634_v34  }
 0x1b4   :  { %731 = vperm.xlu0 %2873, %v3235_v25   ;;  %657 = vperm.xlu1 %2874, %v636_v35  }
 0x1b8   :  { %741 = vperm.xlu0 %2873, %v83_v20   ;;  %726 = vperm.xlu1 %2874, %v3215_v15  }
 0x1bc   :  { %751 = vperm.xlu0 %2873, %v85_v24   ;;  %736 = vperm.xlu1 %2874, %v82_v21  }
 0x1c0   :  { %761 = vperm.xlu0 %2873, %v87_v28   ;;  %746 = vperm.xlu1 %2874, %v84_v29  }
 0x1c4   :  { %908 = vrot.lane.b32.xlu0 %v438_v5, %s3010_s2  ;;  %756 = vperm.xlu1 %2874, %v86_v32  }
 0x1c8   :  { %912 = vrot.lane.b32.xlu0 %v440_v11, %s3010_s2  ;;  %906 = vrot.lane.b32.xlu1 %v3203_v62, %s3010_s2 }
 0x1cc   :  { %916 = vrot.lane.b32.xlu0 %v442_v18, %s3010_s2  ;;  %910 = vrot.lane.b32.xlu1 %v3207_v4, %s3010_s2  ;;  %v60_v4 = vmul.u32 8, %v59_v2 }
 0x1ce   :  { %vm61_vm12 = vcmp.lt.s32.totalorder %v3154_v45, %v60_v4 }
 0x1cf   :  { %vm62_vm15 = vmand %vm58_vm11, %vm61_vm12 }
 0x1d0   :  { %918 = vrot.lane.b32.xlu0 %v443_v17, %s3010_s2  ;;  %914 = vrot.lane.b32.xlu1 %v441_v12, %s3010_s2  ;;  %v3285_v5 = vsel %vm62_vm15, 1.0, %v3011_v3  ;;  %vm772_vm15 = vcmask 31744  }
 0x1d1   :  { %2696 = vmatprep.subr.msk.mxu1 %vm797_vm14, %v3285_v5 }
 0x1d2   :  { %2697 = vmatpush3.msk.msra.mxu1 %vm797_vm14, %v3285_v5 }
 0x1d3   :  { %2710 = vmatprep.subr.bf16.mxu1 %v3011_v3 }
 0x1d4   :  { %947 = vrot.lane.b32.xlu1 %v3101_v9, %s3007_s29  ;;  %945 = vrot.lane.b32.xlu0 %v3108_v10, %s3007_s29  ;;  %v2675_v9 = vpop.f32.mrf.mxu1 }
 0x1d6   :  { %v385_v57 = vpop.f32.mrf.mxu1 }
 0x1d8   :  { %920 = vrot.lane.b32.xlu1 %v444_v23, %s3010_s2 }
 0x206   :  { %v454_v40 = vpop.permute.xlu0 %453 }
 0x207   :  { %v477_v41 = vmul.f32 %v454_v40, %v366_v36 }
 0x209   :  { %2684 = vmatprep.mubr.msk.f32.mxu0 %vm275_vm1, %v477_v41 }
 0x20a   :  { %v458_v43 = vpop.permute.xlu0 %457  ;;  %v456_v46 = vpop.permute.xlu1 %455 }
 0x20b   :  { %v479_v47 = vmul.f32 %v2670_v1, %v458_v43  ;;  %v478_v48 = vmul.f32 %v456_v46, %v369_v38 }
 0x20d   :  { %2685 = vmatmul.mubr.msk.f32.vlgmr.msra.gmra.mxu0 %vm275_vm1, %v478_v48 }
 0x20e   :  { %v460_v10 = vpop.permute.xlu1 %459  ;;  %v462_v49 = vpop.permute.xlu0 %461  ;;  %2687 = vmatprep.mubr.msk.f32.mxu0 %vm275_vm1, %v479_v47 }
 0x20f   :  { %v480_v50 = vmul.f32 %v2671_v37, %v460_v10  ;;  %v481_v51 = vmul.f32 %v462_v49, %v382_v42 }
 0x211   :  { %2688 = vmatmul.mubr.msk.f32.gmra.mxu0 %vm275_vm1, %v480_v50 }
 0x212   :  { %v466_v58 = vpop.permute.xlu0 %465  ;;  %v464_v59 = vpop.permute.xlu1 %463  ;;  %2690 = vmatprep.mubr.msk.f32.mxu0 %vm275_vm1, %v481_v51 }
 0x213   :  { %v483_v60 = vmul.f32 %v2674_v39, %v466_v58  ;;  %v482_v61 = vmul.f32 %v464_v59, %v385_v57 }
 0x215   :  { %2691 = vmatmul.mubr.msk.f32.gmra.mxu0 %vm275_vm1, %v482_v61 }
 0x216   :  { %v468_v62 = vpop.permute.xlu1 %467  ;;  %2693 = vmatprep.mubr.msk.f32.mxu0 %vm275_vm1, %v483_v60 }
 0x217   :  { %v484_v63 = vmul.f32 %v2675_v9, %v468_v62 }
 0x219   :  { %2694 = vmatmul.mubr.msk.f32.gmra.mxu0 %vm275_vm1, %v484_v63 }
 0x21f   :  { %v3292_v6 = vpop.permute.xlu0 %639 }
 0x220   :  { %vm662_vm4 = vcmp.eq.s32.totalorder %v3292_v6, 1 }
 0x223   :  { %v3294_v7 = vpop.permute.xlu1 %645  ;;  %v3296_v11 = vpop.permute.xlu0 %648 }
 0x224   :  { %vm665_vm2 = vcmp.eq.s32.totalorder %v3296_v11, 1  ;;  %vm664_vm5 = vcmp.eq.s32.totalorder %v3294_v7, 1 }
 0x227   :  { %v3298_v12 = vpop.permute.xlu1 %642  ;;  %v3301_v17 = vpop.permute.xlu0 %654 }
 0x228   :  { %vm663_vm3 = vcmp.eq.s32.totalorder %v3298_v12, 1  ;;  %vm667_vm6 = vcmp.eq.s32.totalorder %v3301_v17, 1 }
 0x22b   :  { %v3304_v21 = vpop.permute.xlu1 %651  ;;  %v3317_v33 = vpop.permute.xlu0 %660 }
 0x22c   :  { %vm666_vm7 = vcmp.eq.s32.totalorder %v3304_v21, 1  ;;  %vm669_vm11 = vcmp.eq.s32.totalorder %v3317_v33, 1 }
 0x22f   :  { %v3325_v38 = vpop.permute.xlu1 %657 }
 0x230   :  { %vm3758_vm12 = vcmp.eq.s32.totalorder %v3325_v38, 1 }
 0x233   :  { %v3332_v2 = vpop.permute.xlu1 %726 }
 0x2cd   :  { %v2686_v8 = vpop.f32.mrf.mxu0 }
 0x2ce   :  { %v615_v18 = vmul.f32 0.35355338, %v2686_v8 }
 0x2cf   :  { %v575_v45 = vpop.f32.mrf.mxu0 }
 0x2d0   :  { %v614_v24 = vmul.f32 0.35355338, %v575_v45  ;;  %v671_v27 = vsel %vm663_vm3, %v615_v18, -3.4028235e+38  ;;  %v3334_v45 = vpop.permute.xlu1 %736 }
 0x2d1   :  { %v2689_v13 = vpop.f32.mrf.mxu0 }
 0x2d2   :  { %v617_v14 = vmul.f32 0.35355338, %v2689_v13  ;;  %v670_v35 = vsel %vm662_vm4, %v614_v24, -3.4028235e+38 }
 0x2d3   :  { %v585_v16 = vpop.f32.mrf.mxu0 }
 0x2d4   :  { %v616_v19 = vmul.f32 0.35355338, %v585_v16  ;;  %v673_v22 = vsel %vm665_vm2, %v617_v14, -3.4028235e+38  ;;  %v3336_v16 = vpop.permute.xlu1 %746 }
 0x2d5   :  { %v2692_v20 = vpop.f32.mrf.mxu0  ;;  %v679_v30 = vmax.f32 %v671_v27, %v673_v22 }
 0x2d6   :  { %v619_v23 = vmul.f32 0.35355338, %v2692_v20  ;;  %v672_v31 = vsel %vm664_vm5, %v616_v19, -3.4028235e+38 }
 0x2d7   :  { %v595_v26 = vpop.f32.mrf.mxu0  ;;  %v678_v39 = vmax.f32 %v670_v35, %v672_v31 }
 0x2d8   :  { %v675_v28 = vsel %vm667_vm6, %v619_v23, -3.4028235e+38  ;;  %v618_v29 = vmul.f32 0.35355338, %v595_v26 }
 0x2d9   :  { %v2695_v32 = vpop.f32.mrf.mxu0  ;;  %v681_v1 = vmax.f32 %v679_v30, %v675_v28 }
 0x2da   :  { %v621_v34 = vmul.f32 0.35355338, %v2695_v32  ;;  %v674_v36 = vsel %vm666_vm7, %v618_v29, -3.4028235e+38  ;;  %v3338_v29 = vpop.permute.xlu1 %756 }
 0x2db   :  { %v605_v37 = vpop.f32.mrf.mxu0  ;;  %v680_v43 = vmax.f32 %v678_v39, %v674_v36 }
 0x2dc   :  { %v677_v40 = vsel %vm669_vm11, %v621_v34, -3.4028235e+38  ;;  %v620_v41 = vmul.f32 0.35355338, %v605_v37 }
 0x2dd   :  { %v683_v42 = vmax.f32 %v681_v1, %v677_v40 }
 0x2de   :  { %v676_v46 = vsel %vm3758_vm12, %v620_v41, -3.4028235e+38  ;;  %v907_v34 = vpop.permute.xlu1 %906  ;;  %vm3012_vm12 = vmmov 0  }
 0x2df   :  { %v685_v47 = vsub.f32 %v671_v27, %v683_v42  ;;  %v687_v48 = vsub.f32 %v673_v22, %v683_v42  ;;  %v689_v9 = vsub.f32 %v675_v28, %v683_v42  ;;  %v691_v10 = vsub.f32 %v677_v40, %v683_v42  ;;  %2742 = vmatprep.mubr.msk.bf16.mxu0 %vm3012_vm12, %v3011_v3 }
 0x2e0   :  { %v682_v49 = vmax.f32 %v680_v43, %v676_v46 }
 0x2e1   :  { %v694_v50 = vmul.f32 1.442695, %v685_v47  ;;  %v698_v51 = vmul.f32 1.442695, %v687_v48  ;;  %v702_v57 = vmul.f32 1.442695, %v689_v9 }
 0x2e2   :  { %v706_v58 = vmul.f32 1.442695, %v691_v10  ;;  %v684_v59 = vsub.f32 %v670_v35, %v682_v49  ;;  %v686_v60 = vsub.f32 %v672_v31, %v682_v49  ;;  %v688_v61 = vsub.f32 %v674_v36, %v682_v49  ;;  %v911_v35 = vpop.permute.xlu1 %910  ;;  %v3340_v36 = vpop.permute.xlu0 %731 }
 0x2e3   :  { %2911 = vpow2.f32 %v694_v50  ;;  %v690_v62 = vsub.f32 %v676_v46, %v682_v49 }
 0x2e4   :  { %2913 = vpow2.f32 %v698_v51  ;;  %v692_v63 = vmul.f32 1.442695, %v684_v59  ;;  %v696_v0 = vmul.f32 1.442695, %v686_v60  ;;  %v700_v4 = vmul.f32 1.442695, %v688_v61 }
 0x2e5   :  { %2915 = vpow2.f32 %v702_v57  ;;  %v704_v8 = vmul.f32 1.442695, %v690_v62 }
 0x2e6   :  { %2917 = vpow2.f32 %v706_v58  ;;  %v915_v39 = vpop.permute.xlu1 %914  ;;  %v3342_v43 = vpop.permute.xlu0 %741 }
 0x2e7   :  { %2919 = vpow2.f32 %v692_v63 }
 0x2e8   :  { %2921 = vpow2.f32 %v696_v0 }
 0x2e9   :  { %2923 = vpow2.f32 %v700_v4 }
 0x2ea   :  { %2925 = vpow2.f32 %v704_v8  ;;  %v948_v49 = vpop.permute.xlu1 %947  ;;  %v3352_v57 = vpop.permute.xlu0 %751 }
 0x2ee   :  { %v3360_v63 = vpop.permute.xlu0 %761 }
 0x2f0   :  { %v2912_v13 = vpop.eup %2911 }
 0x2f1   :  { %v2914_v14 = vpop.eup %2913 }
 0x2f2   :  { %v2916_v18 = vpop.eup %2915  ;;  %v709_v19 = vadd.f32 %v2914_v14, %v2912_v13  ;;  %v909_v4 = vpop.permute.xlu0 %908 }
 0x2f3   :  { %v2918_v20 = vpop.eup %2917 }
 0x2f4   :  { %v2920_v22 = vpop.eup %2919  ;;  %v711_v23 = vadd.f32 %v2916_v18, %v709_v19 }
 0x2f5   :  { %v2922_v24 = vpop.eup %2921 }
 0x2f6   :  { %v713_v26 = vadd.f32 %v2918_v20, %v711_v23  ;;  %v708_v27 = vadd.f32 %v2922_v24, %v2920_v22  ;;  %v2924_v28 = vpop.eup %2923  ;;  %v913_v8 = vpop.permute.xlu0 %912 }
 0x2f7   :  { %v2926_v31 = vpop.eup %2925 }
 0x2f8   :  { %v710_v30 = vadd.f32 %v2924_v28, %v708_v27  ;;  %2927 = vrcp.f32 %v713_v26 }
 0x2fa   :  { %v712_v32 = vadd.f32 %v2926_v31, %v710_v30 }
 0x2fc   :  { %2929 = vrcp.f32 %v712_v32 }
 0x305   :  { %v2928_v1 = vpop.eup %2927 }
 0x306   :  { %v717_v40 = vmul.f32 %v2928_v1, %v2912_v13  ;;  %v719_v48 = vmul.f32 %v2928_v1, %v2914_v14  ;;  %v721_v51 = vmul.f32 %v2928_v1, %v2916_v18  ;;  %v723_v61 = vmul.f32 %v2928_v1, %v2918_v20  ;;  %v917_v13 = vpop.permute.xlu0 %916 }
 0x308   :  { %v765_v47 = vmul.f32 %v3340_v36, %v717_v40  ;;  %v767_v50 = vmul.f32 %v3342_v43, %v719_v48  ;;  %v769_v60 = vmul.f32 %v3352_v57, %v721_v51  ;;  %v771_v0 = vmul.f32 %v3360_v63, %v723_v61 }
 0x309   :  { %v2930_v37 = vpop.eup %2929 }
 0x30a   :  { %v716_v41 = vmul.f32 %v2930_v37, %v2920_v22  ;;  %v718_v42 = vmul.f32 %v2930_v37, %v2922_v24  ;;  %v720_v10 = vmul.f32 %v2930_v37, %v2924_v28  ;;  %v722_v59 = vmul.f32 %v2930_v37, %v2926_v31  ;;  %v919_v14 = vpop.permute.xlu0 %918  ;;  %v921_v37 = vpop.permute.xlu1 %920 }
 0x30c   :  { %v764_v46 = vmul.f32 %v3332_v2, %v716_v41  ;;  %v766_v9 = vmul.f32 %v3334_v45, %v718_v42  ;;  %v768_v58 = vmul.f32 %v3336_v16, %v720_v10  ;;  %v770_v62 = vmul.f32 %v3338_v29, %v722_v59 }
 0x30e   :  { %2698 = vmatprep.mubr.msk.f32.mxu1 %vm772_vm15, %v764_v46  ;;  %v946_v18 = vpop.permute.xlu0 %945 }
 0x30f   :  { %2699 = vmatmul.mubr.msk.f32.vlgmr.msra.gmra.mxu1 %vm772_vm15, %v765_v47 }
 0x310   :  { %2701 = vmatprep.mubr.msk.f32.mxu1 %vm772_vm15, %v766_v9  ;;  %2711 = vmatpush3.bf16.msra.mxu1 %v948_v49 }
 0x311   :  { %2712 = vmatprep.subr.bf16.mxu1 %v3011_v3 }
 0x313   :  { %2702 = vmatmul.mubr.msk.f32.gmra.mxu1 %vm772_vm15, %v767_v50 }
 0x314   :  { %2704 = vmatprep.mubr.msk.f32.mxu1 %vm772_vm15, %v768_v58  ;;  %2713 = vmatpush3.bf16.msra.mxu1 %v946_v18 }
 0x315   :  { %2718 = vmatprep.subr.bf16.mxu1 %v3011_v3 }
 0x317   :  { %2705 = vmatmul.mubr.msk.f32.gmra.mxu1 %vm772_vm15, %v769_v60 }
 0x318   :  { %2707 = vmatprep.mubr.msk.f32.mxu1 %vm772_vm15, %v770_v62 }
 0x31b   :  { %2708 = vmatmul.mubr.msk.f32.gmra.mxu1 %vm772_vm15, %v771_v0 }
 0x31c   :  { %2714 = vmatprep.mubr.msk.bf16.mxu1 %vm3012_vm12, %v3011_v3 }
 0x3cf   :  { %v2700_v19 = vpop.f32.mrf.mxu1 }
 0x3d0   :  { %v931_v30 = vmul.f32 %v2700_v19, %v909_v4 }
 0x3d1   :  { %v867_v20 = vpop.f32.mrf.mxu1 }
 0x3d2   :  { %v930_v31 = vmul.f32 %v907_v34, %v867_v20 }
 0x3d3   :  { %v2703_v22 = vpop.f32.mrf.mxu1 }
 0x3d4   :  { %v933_v26 = vmul.f32 %v2703_v22, %v913_v8  ;;  %v2887_v22 = vld [vmem:[%s3753_s4 + $0x8] sm:$0xff]  }
 0x3d5   :  { %v877_v23 = vpop.f32.mrf.mxu1 }
 0x3d6   :  { %v932_v27 = vmul.f32 %v911_v35, %v877_v23  ;;  %v939_v41 = vadd.f32 %v933_v26, %v931_v30  ;;  %v2888_v23 = vld [vmem:[%s3753_s4] sm:$0xff]   ;;  %v2890_v26 = vld [vmem:[%s3754_s5 + $0x30] sm:$0xff]   ;;  %v2893_v30 = vld [vmem:[%s3754_s5 + $0x18] sm:$0xff]  }
 0x3d7   :  { %v2706_v24 = vpop.f32.mrf.mxu1 }
 0x3d8   :  { %v935_v32 = vmul.f32 %v2706_v24, %v917_v13  ;;  %v938_v42 = vadd.f32 %v932_v27, %v930_v31  ;;  %v2889_v24 = vld [vmem:[%s3754_s5 + $0x38] sm:$0xff]   ;;  %v2891_v27 = vld [vmem:[%s3754_s5 + $0x28] sm:$0xff]  }
 0x3d9   :  { %v887_v28 = vpop.f32.mrf.mxu1  ;;  %2727 = vmatpush3.bf16.msra.mxu0 %v2889_v24 }
 0x3da   :  { %v934_v1 = vmul.f32 %v915_v39, %v887_v28  ;;  %v941_v48 = vadd.f32 %v939_v41, %v935_v32  ;;  %2728 = vmatprep.subr.bf16.mxu0 %v3011_v3  ;;  %v2892_v28 = vld [vmem:[%s3754_s5 + $0x20] sm:$0xff]  }
 0x3db   :  { %v2709_v40 = vpop.f32.mrf.mxu1 }
 0x3dc   :  { %v937_v46 = vmul.f32 %v2709_v40, %v921_v37  ;;  %v940_v9 = vadd.f32 %v938_v42, %v934_v1  ;;  %v1018_v42 = vsub.s32 0, %v3152_v44 }
 0x3dd   :  { %v897_v47 = vpop.f32.mrf.mxu1  ;;  %2729 = vmatpush3.bf16.msra.mxu0 %v2890_v26 }
 0x3de   :  { %v936_v10 = vmul.f32 %v919_v14, %v897_v47  ;;  %v943_v49 = vadd.f32 %v941_v48, %v937_v46  ;;  %2730 = vmatprep.subr.bf16.mxu0 %v3011_v3  ;;  %v3408_v46 = vld [vmem:[%s3755_s6] sm:$0xff]  ;;  %v1030_v48 = vsub.s32 1, %v3152_v44 }
 0x3df   :  { %v1019_v47 = vrot.slane %v3408_v46, %v1018_v42 }
 0x3e0   :  { %v942_v50 = vadd.f32 %v940_v9, %v936_v10 }
 0x3e1   :  { %2731 = vmatpush3.bf16.msra.mxu0 %v2891_v27  ;;  %v1120_v27 = vsub.s32 4, %v3152_v44 }
 0x3e2   :  { %v944_v51 = vpack.c.bf16 %v943_v49, %v942_v50  ;;  %2732 = vmatprep.subr.bf16.mxu0 %v3011_v3 }
 0x3e4   :  { %2715 = vmatmul.mubr.msk.bf16.vlgmr.msra.gmra.mxu1 %vm275_vm1, %v944_v51  ;;  %v1031_v51 = vrot.slane %v3408_v46, %v1030_v48 }
 0x3e5   :  { %2722 = vmatprep.mubr.msk.bf16.mxu1 %vm3012_vm12, %v3011_v3  ;;  %2719 = vmatpush3.bf16.msra.mxu1 %v2887_v22 }
 0x3e6   :  { %2720 = vmatprep.subr.bf16.mxu1 %v3011_v3  ;;  %2733 = vmatpush3.bf16.msra.mxu0 %v2892_v28  ;;  %v1121_v28 = vrot.slane %v3408_v46, %v1120_v27 }
 0x3e7   :  { %2734 = vmatprep.subr.bf16.mxu0 %v3011_v3 }
 0x3e9   :  { %2721 = vmatpush3.bf16.msra.mxu1 %v2888_v23 }
 0x3ea   :  { %2735 = vmatpush3.bf16.msra.mxu0 %v2893_v30 }
 0x3eb   :  { %2736 = vmatprep.subr.bf16.mxu0 %v3011_v3 }
 0x4a4   :  { %v988_v34 = vpop.f32.mrf.mxu1 }
 0x4a5   :  { %v995_v35 = vsel %vm275_vm1, %v988_v34, 0.0 }
 0x4a6   :  { %996 = vadd.xlane.f32.xlu1 %v995_v35  ;;  %v2716_v39 = vpop.f32.mrf.mxu1 }
 0x4a8   :  { %v991_v58 = vpop.f32.mrf.mxu1 }
 0x4a9   :  { %v998_v59 = vsel %vm275_vm1, %v991_v58, 0.0 }
 0x4aa   :  { %999 = vadd.xlane.f32.xlu0 %v998_v59  ;;  %v2717_v60 = vpop.f32.mrf.mxu1 }
 0x4ab   :  { %v2975_v60 = vld [vmem:[%s3750_s1] sm:$0xff]  }
 0x52f   :  { %v997_v61 = vpop.xlane.xlu1 %996 }
 0x530   :  { %v1002_v62 = vmul.f32 0.03125, %v997_v61  ;;  %v2894_v61 = vld [vmem:[%s3754_s5 + $0x10] sm:$0xff]  }
 0x531   :  { %2737 = vmatpush3.bf16.msra.mxu0 %v2894_v61 }
 0x532   :  { %v1004_v0 = vsub.f32 %v988_v34, %v1002_v62  ;;  %2738 = vmatprep.subr.bf16.mxu0 %v3011_v3  ;;  %v2895_v62 = vld [vmem:[%s3754_s5 + $0x8] sm:$0xff]  }
 0x533   :  { %v1000_v4 = vpop.xlane.xlu0 %999 }
 0x534   :  { %v1003_v8 = vmul.f32 0.03125, %v1000_v4  ;;  %v1006_v13 = vmul.f32 %v1004_v0, %v1004_v0  ;;  %v1020_v10 = vmul.f32 %v1019_v47, %v1004_v0  ;;  %v2896_v0 = vld [vmem:[%s3754_s5] sm:$0xff]   ;;  %v1041_v4 = vsub.s32 5, %v3152_v44 }
 0x535   :  { %2739 = vmatpush3.bf16.msra.mxu0 %v2895_v62 }
 0x536   :  { %v1005_v14 = vsub.f32 %v991_v58, %v1003_v8  ;;  %v1008_v18 = vsel %vm275_vm1, %v1006_v13, 0.0  ;;  %2740 = vmatprep.subr.bf16.mxu0 %v3011_v3  ;;  %v1042_v8 = vrot.slane %v3408_v46, %v1041_v4 }
 0x537   :  { %1009 = vadd.xlane.f32.xlu0 %v1008_v18 }
 0x538   :  { %v1007_v19 = vmul.f32 %v1005_v14, %v1005_v14  ;;  %v1021_v49 = vmul.f32 %v1019_v47, %v1005_v14 }
 0x539   :  { %2741 = vmatpush3.bf16.msra.mxu0 %v2896_v0 }
 0x53a   :  { %v1011_v20 = vsel %vm275_vm1, %v1007_v19, 0.0 }
 0x53b   :  { %1012 = vadd.xlane.f32.xlu1 %v1011_v20 }
 0x5c0   :  { %v1010_v31 = vpop.xlane.xlu0 %1009 }
 0x5c1   :  { %v1014_v32 = vmul.f32 0.03125, %v1010_v31 }
 0x5c3   :  { %v1022_v1 = vadd.f32 1e-06, %v1014_v32 }
 0x5c4   :  { %v1013_v37 = vpop.xlane.xlu1 %1012 }
 0x5c5   :  { %2931 = vrsqrt.f32 %v1022_v1  ;;  %v1015_v40 = vmul.f32 0.03125, %v1013_v37 }
 0x5c7   :  { %v1023_v41 = vadd.f32 1e-06, %v1015_v40 }
 0x5c9   :  { %2933 = vrsqrt.f32 %v1023_v41 }
 0x5d2   :  { %v2932_v9 = vpop.eup %2931 }
 0x5d3   :  { %v1026_v50 = vmul.f32 %v2932_v9, %v1020_v10 }
 0x5d5   :  { %v1032_v39 = vadd.f32 %v1031_v51, %v1026_v50 }
 0x5d6   :  { %v2934_v34 = vpop.eup %2933 }
 0x5d7   :  { %v1027_v35 = vmul.f32 %v2934_v34, %v1021_v49  ;;  %v3013_v49 = vmov 1  }
 0x5d8   :  { %2875 = vset.pattern.permute.xlu0 %v3013_v49  ;;  %2876 = vset.pattern.permute.xlu1 %v3013_v49  ;;  %v3524_v49 = vld [vmem:[%s3752_s3 + $0x18] sm:$0xff]  }
 0x5d9   :  { %v1033_v58 = vadd.f32 %v1031_v51, %v1027_v35  ;;  %2764 = vmatprep.subr.bf16.mxu0 %v3524_v49 }
 0x5db   :  { %v1034_v59 = vpack.c.bf16 %v1033_v58, %v1032_v39 }
 0x5dd   :  { %2723 = vmatmul.mubr.msk.bf16.vlgmr.msra.gmra.mxu1 %vm275_vm1, %v1034_v59 }
 0x5de   :  { %2748 = vmatprep.mubr.msk.bf16.mxu1 %vm133_vm0, %v2975_v60 }
 0x69d   :  { %v1092_v13 = vpop.f32.mrf.mxu1 }
 0x69e   :  { %v1093_v18 = vadd.f32 %v1092_v13, %v1042_v8 }
 0x69f   :  { %v2724_v14 = vpop.f32.mrf.mxu1 }
 0x6a0   :  { %v1099_v23 = vmax.f32 %v1093_v18, 0.0 }
 0x6a1   :  { %v1095_v19 = vpop.f32.mrf.mxu1 }
 0x6a2   :  { %v1096_v20 = vadd.f32 %v1095_v19, %v1042_v8 }
 0x6a3   :  { %v2725_v22 = vpop.f32.mrf.mxu1 }
 0x6a4   :  { %v1100_v24 = vmax.f32 %v1096_v20, 0.0  ;;  %v1235_v20 = vsub.s32 2, %v3152_v44 }
 0x6a6   :  { %v1101_v26 = vpack.c.bf16 %v1100_v24, %v1099_v23  ;;  %v1236_v22 = vrot.slane %v3408_v46, %v1235_v20  ;;  %v1247_v23 = vsub.s32 3, %v3152_v44 }
 0x6a8   :  { %2743 = vmatmul.mubr.bf16.vlgmr.msra.gmra.mxu0 %v1101_v26 }
 0x6a9   :  { %2765 = vmatpush3.bf16.msra.mxu0 %v3524_v49 }
 0x768   :  { %v1204_v30 = vpop.f32.mrf.mxu0 }
 0x769   :  { %v1205_v31 = vadd.f32 %v1204_v30, %v1121_v28 }
 0x76a   :  { %v2744_v32 = vpop.f32.mrf.mxu0 }
 0x76b   :  { %v1211_v1 = vadd.f32 %v1205_v31, %v1032_v39 }
 0x76c   :  { %v1207_v37 = vpop.f32.mrf.mxu0 }
 0x76d   :  { %v1208_v40 = vadd.f32 %v1207_v37, %v1121_v28  ;;  %v1213_v41 = vsel %vm275_vm1, %v1211_v1, 0.0 }
 0x76e   :  { %1214 = vadd.xlane.f32.xlu0 %v1213_v41  ;;  %v2745_v47 = vpop.f32.mrf.mxu0 }
 0x76f   :  { %v1212_v9 = vadd.f32 %v1208_v40, %v1033_v58 }
 0x771   :  { %v1216_v10 = vsel %vm275_vm1, %v1212_v9, 0.0 }
 0x772   :  { %1217 = vadd.xlane.f32.xlu1 %v1216_v10  ;;  %v2977_v10 = vld [vmem:[%s3750_s1 + $0x10] sm:$0xff]  }
 0x7f7   :  { %v1215_v50 = vpop.xlane.xlu0 %1214 }
 0x7f8   :  { %v1219_v51 = vmul.f32 0.03125, %v1215_v50  ;;  %v3531_v50 = vld [vmem:[%s3752_s3 + $0x10] sm:$0xff]  }
 0x7f9   :  { %2766 = vmatprep.subr.bf16.mxu0 %v3531_v50 }
 0x7fa   :  { %v1221_v34 = vsub.f32 %v1211_v1, %v1219_v51  ;;  %2767 = vmatpush3.bf16.msra.mxu0 %v3531_v50  ;;  %v2461_v51 = vld [vmem:[%s3749_s0 + $0x40] sm:$0xff] }
 0x7fb   :  { %v1218_v35 = vpop.xlane.xlu1 %1217  ;;  %2818 = vmatprep.subr.bf16.mxu0 %v3011_v3 }
 0x7fc   :  { %v1220_v59 = vmul.f32 0.03125, %v1218_v35  ;;  %v1223_v60 = vmul.f32 %v1221_v34, %v1221_v34  ;;  %v1237_v24 = vmul.f32 %v1236_v22, %v1221_v34  ;;  %v2462_v34 = vld [vmem:[%s3749_s0 + $0x48] sm:$0xff]  ;;  %v2468_v35 = vld [vmem:[%s3749_s0 + $0x78] sm:$0xff] }
 0x7fe   :  { %v1222_v39 = vsub.f32 %v1212_v9, %v1220_v59  ;;  %v1225_v61 = vsel %vm275_vm1, %v1223_v60, 0.0  ;;  %v2463_v59 = vld [vmem:[%s3749_s0 + $0x50] sm:$0xff]  ;;  %v2464_v60 = vld [vmem:[%s3749_s0 + $0x58] sm:$0xff] }
 0x7ff   :  { %1226 = vadd.xlane.f32.xlu0 %v1225_v61  ;;  %v2466_v61 = vld [vmem:[%s3749_s0 + $0x68] sm:$0xff] }
 0x800   :  { %v1224_v62 = vmul.f32 %v1222_v39, %v1222_v39  ;;  %v1238_v28 = vmul.f32 %v1236_v22, %v1222_v39  ;;  %v2465_v39 = vld [vmem:[%s3749_s0 + $0x60] sm:$0xff] }
 0x802   :  { %v1228_v0 = vsel %vm275_vm1, %v1224_v62, 0.0  ;;  %v2467_v62 = vld [vmem:[%s3749_s0 + $0x70] sm:$0xff] }
 0x803   :  { %1229 = vadd.xlane.f32.xlu1 %v1228_v0 }
 0x814   :  { %1256 = vperm.xlu1 %2876, %v3235_v25  }
 0x815   :  { %1252 = vperm.xlu0 %2875, %v3215_v15   ;;  %v1248_v15 = vrot.slane %v3408_v46, %v1247_v23  ;;  %v2976_v46 = vld [vmem:[%s3750_s1 + $0x8] sm:$0xff]  }
 0x818   :  { %1524 = vrot.lane.b32.xlu1 %v2461_v51, %s3007_s29 }
 0x819   :  { %1538 = vrot.lane.b32.xlu0 %v2468_v35, %s3007_s29 }
 0x81c   :  { %1526 = vrot.lane.b32.xlu1 %v2462_v34, %s3007_s29 }
 0x820   :  { %1528 = vrot.lane.b32.xlu1 %v2463_v59, %s3007_s29 }
 0x824   :  { %1530 = vrot.lane.b32.xlu1 %v2464_v60, %s3007_s29 }
 0x828   :  { %1532 = vrot.lane.b32.xlu1 %v2465_v39, %s3007_s29 }
 0x82c   :  { %1534 = vrot.lane.b32.xlu1 %v2466_v61, %s3007_s29 }
 0x830   :  { %1536 = vrot.lane.b32.xlu1 %v2467_v62, %s3007_s29 }
 0x888   :  { %v1227_v58 = vpop.xlane.xlu0 %1226 }
 0x889   :  { %v1231_v8 = vmul.f32 0.03125, %v1227_v58 }
 0x88b   :  { %v1239_v13 = vadd.f32 1e-06, %v1231_v8 }
 0x88c   :  { %v1230_v14 = vpop.xlane.xlu1 %1229 }
 0x88d   :  { %2935 = vrsqrt.f32 %v1239_v13  ;;  %v1232_v18 = vmul.f32 0.03125, %v1230_v14 }
 0x88f   :  { %v1240_v19 = vadd.f32 1e-06, %v1232_v18 }
 0x890   :  { %v3455_v1 = vpop.permute.xlu0 %1252  ;;  %v3457_v37 = vpop.permute.xlu1 %1256 }
 0x891   :  { %2937 = vrsqrt.f32 %v1240_v19 }
 0x89a   :  { %v2936_v25 = vpop.eup %2935 }
 0x89b   :  { %v1243_v26 = vmul.f32 %v2936_v25, %v1237_v24 }
 0x89d   :  { %v1249_v31 = vadd.f32 %v1248_v15, %v1243_v26 }
 0x89e   :  { %v2938_v30 = vpop.eup %2937 }
 0x89f   :  { %v1244_v32 = vmul.f32 %v2938_v30, %v1238_v28  ;;  %v3460_v41 = vmul.f32 %v3455_v1, %v1249_v31 }
 0x8a1   :  { %v1250_v40 = vadd.f32 %v1248_v15, %v1244_v32 }
 0x8a3   :  { %v3463_v47 = vmul.f32 %v3457_v37, %v1250_v40 }
 0x8a5   :  { %v1268_v9 = vpack.c.bf16 %v3463_v47, %v3460_v41 }
 0x8a7   :  { %2746 = vmatprep.subr.bf16.mxu1 %v1268_v9 }
 0x8a8   :  { %2747 = vmatpush3.bf16.msra.mxu1 %v1268_v9 }
 0x8a9   :  { %2784 = vmatprep.subr.msk.mxu1 %vm3161_vm8, %v3008_v53 }
 0x8ab   :  { %2749 = vmatmul.mubr.msk.bf16.vlgmr.msra.gmra.mxu1 %vm133_vm0, %v2976_v46 }
 0x8ac   :  { %2752 = vmatprep.mubr.msk.bf16.mxu1 %vm133_vm0, %v2977_v10  ;;  %2785 = vmatpush3.msk.msra.mxu1 %vm3161_vm8, %v3008_v53 }
 0x8ad   :  { %2786 = vmatprep.subr.msk.mxu1 %vm3168_vm9, %v3008_v53 }
 0x8ae   :  { %2787 = vmatpush3.msk.msra.mxu1 %vm3168_vm9, %v3008_v53 }
 0x8af   :  { %2788 = vmatprep.subr.msk.mxu1 %vm3175_vm10, %v3008_v53 }
 0x8b0   :  { %2789 = vmatpush3.msk.msra.mxu1 %vm3175_vm10, %v3008_v53 }
 0x8b1   :  { %2790 = vmatprep.subr.msk.mxu1 %vm3193_vm13, %v3008_v53 }
 0x8b2   :  { %2791 = vmatpush3.msk.msra.mxu1 %vm3193_vm13, %v3008_v53  ;;  %v2981_v53 = vld [vmem:[%s3750_s1 + $0x30] sm:$0xff]  }
 0x8b3   :  { %2753 = vmatmul.mubr.msk.bf16.gmra.mxu1 %vm133_vm0, %v2978_v52  ;;  %2804 = vmatprep.subr.msk.mxu1 %vm797_vm14, %v3285_v5 }
 0x8b4   :  { %2756 = vmatprep.mubr.msk.bf16.mxu1 %vm133_vm0, %v2979_v54 }
 0x8bb   :  { %2757 = vmatmul.mubr.msk.bf16.gmra.mxu1 %vm133_vm0, %v2980_v55 }
 0x8bc   :  { %2760 = vmatprep.mubr.msk.bf16.mxu1 %vm133_vm0, %v2981_v53 }
 0x8c3   :  { %2761 = vmatmul.mubr.msk.bf16.gmra.mxu1 %vm133_vm0, %v2982_v56  ;;  %v1525_v56 = vpop.permute.xlu1 %1524  ;;  %vm3767_vm0 = vcmp.eq.s32.totalorder %v3325_v38, 1 }
 0x8c7   :  { %v1527_v51 = vpop.permute.xlu1 %1526 }
 0x8cb   :  { %v1529_v34 = vpop.permute.xlu1 %1528 }
 0x8cf   :  { %v1531_v35 = vpop.permute.xlu1 %1530 }
 0x8d3   :  { %v1533_v59 = vpop.permute.xlu1 %1532 }
 0x96b   :  { %v2750_v0 = vpop.f32.mrf.mxu1 }
 0x96d   :  { %v1303_v58 = vpop.f32.mrf.mxu1 }
 0x96f   :  { %v2751_v8 = vpop.f32.mrf.mxu1 }
 0x970   :  { %v1367_v18 = vpack.c.bf16 %v2751_v8, %v2750_v0  ;;  %v1535_v0 = vpop.permute.xlu1 %1534 }
 0x971   :  { %v1306_v13 = vpop.f32.mrf.mxu1 }
 0x972   :  { %v1366_v14 = vpack.c.bf16 %v1306_v13, %v1303_v58 }
 0x973   :  { %v2754_v19 = vpop.f32.mrf.mxu1 }
 0x974   :  { %2768 = vmatprep.mubr.msk.bf16.mxu0 %vm275_vm1, %v1366_v14 }
 0x975   :  { %v1319_v22 = vpop.f32.mrf.mxu1  ;;  %2769 = vmatmul.mubr.msk.bf16.vlgmr.msra.gmra.mxu0 %vm275_vm1, %v1367_v18 }
 0x977   :  { %v2755_v24 = vpop.f32.mrf.mxu1 }
 0x978   :  { %v1369_v15 = vpack.c.bf16 %v2755_v24, %v2754_v19  ;;  %v1537_v24 = vpop.permute.xlu1 %1536 }
 0x979   :  { %v1322_v25 = vpop.f32.mrf.mxu1 }
 0x97a   :  { %v1368_v26 = vpack.c.bf16 %v1322_v25, %v1319_v22 }
 0x97b   :  { %v2758_v28 = vpop.f32.mrf.mxu1 }
 0x97c   :  { %2772 = vmatprep.mubr.msk.bf16.mxu0 %vm275_vm1, %v1368_v26 }
 0x97d   :  { %2773 = vmatmul.mubr.msk.bf16.gmra.mxu0 %vm275_vm1, %v1369_v15  ;;  %v1335_v30 = vpop.f32.mrf.mxu1 }
 0x97f   :  { %v2759_v31 = vpop.f32.mrf.mxu1 }
 0x980   :  { %v1371_v32 = vpack.c.bf16 %v2759_v31, %v2758_v28 }
 0x981   :  { %v1338_v40 = vpop.f32.mrf.mxu1 }
 0x982   :  { %v1370_v9 = vpack.c.bf16 %v1338_v40, %v1335_v30  ;;  %v1539_v30 = vpop.permute.xlu0 %1538 }
 0x983   :  { %v2762_v46 = vpop.f32.mrf.mxu1 }
 0x984   :  { %2776 = vmatprep.mubr.msk.bf16.mxu0 %vm275_vm1, %v1370_v9 }
 0x985   :  { %v1351_v10 = vpop.f32.mrf.mxu1  ;;  %2777 = vmatmul.mubr.msk.bf16.gmra.mxu0 %vm275_vm1, %v1371_v32 }
 0x987   :  { %v2763_v52 = vpop.f32.mrf.mxu1 }
 0x988   :  { %v1373_v54 = vpack.c.bf16 %v2763_v52, %v2762_v46 }
 0x989   :  { %v1354_v55 = vpop.f32.mrf.mxu1 }
 0x98a   :  { %v1372_v53 = vpack.c.bf16 %v1354_v55, %v1351_v10 }
 0x98c   :  { %2780 = vmatprep.mubr.msk.bf16.mxu0 %vm275_vm1, %v1372_v53 }
 0x98d   :  { %2781 = vmatmul.mubr.msk.bf16.gmra.mxu0 %vm275_vm1, %v1373_v54 }
 0x98e   :  { %2822 = vmatprep.mubr.msk.bf16.mxu0 %vm3012_vm12, %v3011_v3 }
 0xa35   :  { %v2770_v60 = vpop.f32.mrf.mxu0 }
 0xa36   :  { %v1550_v8 = vadd.f32 %v2770_v60, %v1529_v34 }
 0xa37   :  { %v1444_v39 = vpop.f32.mrf.mxu0 }
 0xa38   :  { %v1548_v61 = vadd.f32 %v1525_v56, %v1444_v39 }
 0xa39   :  { %v2771_v62 = vpop.f32.mrf.mxu0 }
 0xa3a   :  { %1564 = vrot.lane.b32.xlu1 %v1548_v61, %s3009_s20  ;;  %v1551_v19 = vadd.f32 %v2771_v62, %v1531_v35 }
 0xa3b   :  { %v1447_v58 = vpop.f32.mrf.mxu0 }
 0xa3c   :  { %v1549_v13 = vadd.f32 %v1527_v51, %v1447_v58 }
 0xa3d   :  { %v2774_v14 = vpop.f32.mrf.mxu0 }
 0xa3e   :  { %1568 = vrot.lane.b32.xlu1 %v1550_v8, %s3009_s20  ;;  %1566 = vrot.lane.b32.xlu0 %v1549_v13, %s3009_s20  ;;  %v1554_v15 = vadd.f32 %v2774_v14, %v1537_v24 }
 0xa3f   :  { %v1460_v18 = vpop.f32.mrf.mxu0 }
 0xa40   :  { %v1552_v22 = vadd.f32 %v1533_v59, %v1460_v18 }
 0xa41   :  { %v2775_v25 = vpop.f32.mrf.mxu0 }
 0xa42   :  { %1570 = vrot.lane.b32.xlu0 %v1551_v19, %s3009_s20  ;;  %1572 = vrot.lane.b32.xlu1 %v1552_v22, %s3009_s20  ;;  %v1555_v31 = vadd.f32 %v2775_v25, %v1539_v30 }
 0xa43   :  { %v1463_v26 = vpop.f32.mrf.mxu0 }
 0xa44   :  { %v1553_v28 = vadd.f32 %v1535_v0, %v1463_v26 }
 0xa45   :  { %v2778_v32 = vpop.f32.mrf.mxu0 }
 0xa46   :  { %1576 = vrot.lane.b32.xlu1 %v1554_v15, %s3009_s20  ;;  %1574 = vrot.lane.b32.xlu0 %v1553_v28, %s3009_s20 }
 0xa47   :  { %v1476_v40 = vpop.f32.mrf.mxu0 }
 0xa49   :  { %v2779_v9 = vpop.f32.mrf.mxu0 }
 0xa4a   :  { %1924 = vrot.lane.b32.xlu1 %v1548_v61, %s3010_s2  ;;  %1578 = vrot.lane.b32.xlu0 %v1555_v31, %s3009_s20 }
 0xa4b   :  { %v1479_v46 = vpop.f32.mrf.mxu0 }
 0xa4d   :  { %v2782_v10 = vpop.f32.mrf.mxu0 }
 0xa4e   :  { %1928 = vrot.lane.b32.xlu1 %v1550_v8, %s3010_s2  ;;  %1926 = vrot.lane.b32.xlu0 %v1549_v13, %s3010_s2 }
 0xa4f   :  { %v1492_v55 = vpop.f32.mrf.mxu0 }
 0xa51   :  { %v2783_v34 = vpop.f32.mrf.mxu0 }
 0xa52   :  { %1932 = vrot.lane.b32.xlu1 %v1552_v22, %s3010_s2  ;;  %1930 = vrot.lane.b32.xlu0 %v1551_v19, %s3010_s2 }
 0xa53   :  { %v1495_v39 = vpop.f32.mrf.mxu0 }
 0xa56   :  { %1965 = vrot.lane.b32.xlu1 %v3524_v49, %s3007_s29  ;;  %1934 = vrot.lane.b32.xlu0 %v1553_v28, %s3010_s2 }
 0xa5a   :  { %1938 = vrot.lane.b32.xlu1 %v1555_v31, %s3010_s2  ;;  %1936 = vrot.lane.b32.xlu0 %v1554_v15, %s3010_s2 }
 0xa5e   :  { %1963 = vrot.lane.b32.xlu0 %v3531_v50, %s3007_s29 }
 0xaac   :  { %v1565_v52 = vpop.permute.xlu1 %1564 }
 0xaad   :  { %v1588_v54 = vmul.f32 %v1565_v52, %v1476_v40 }
 0xaaf   :  { %2792 = vmatprep.mubr.msk.f32.mxu1 %vm275_vm1, %v1588_v54 }
 0xab0   :  { %v1569_v49 = vpop.permute.xlu1 %1568  ;;  %v1567_v53 = vpop.permute.xlu0 %1566 }
 0xab1   :  { %v1590_v56 = vmul.f32 %v2778_v32, %v1569_v49  ;;  %v1589_v51 = vmul.f32 %v1567_v53, %v1479_v46 }
 0xab3   :  { %2793 = vmatmul.mubr.msk.f32.vlgmr.msra.gmra.mxu1 %vm275_vm1, %v1589_v51 }
 0xab4   :  { %v1571_v35 = vpop.permute.xlu0 %1570  ;;  %v1573_v59 = vpop.permute.xlu1 %1572  ;;  %2795 = vmatprep.mubr.msk.f32.mxu1 %vm275_vm1, %v1590_v56  ;;  %2805 = vmatpush3.msk.msra.mxu1 %vm797_vm14, %v3285_v5 }
 0xab5   :  { %v1591_v50 = vmul.f32 %v2779_v9, %v1571_v35  ;;  %v1592_v60 = vmul.f32 %v1573_v59, %v1492_v55  ;;  %2826 = vmatprep.subr.bf16.mxu1 %v3011_v3 }
 0xab7   :  { %2796 = vmatmul.mubr.msk.f32.gmra.mxu1 %vm275_vm1, %v1591_v50 }
 0xab8   :  { %v1577_v61 = vpop.permute.xlu1 %1576  ;;  %v1575_v62 = vpop.permute.xlu0 %1574  ;;  %2798 = vmatprep.mubr.msk.f32.mxu1 %vm275_vm1, %v1592_v60 }
 0xab9   :  { %v1594_v0 = vmul.f32 %v2782_v10, %v1577_v61  ;;  %v1593_v58 = vmul.f32 %v1575_v62, %v1495_v39 }
 0xabb   :  { %2799 = vmatmul.mubr.msk.f32.gmra.mxu1 %vm275_vm1, %v1593_v58 }
 0xabc   :  { %v3607_v8 = vpop.permute.xlu1 %1924  ;;  %v1579_v13 = vpop.permute.xlu0 %1578  ;;  %2801 = vmatprep.mubr.msk.f32.mxu1 %vm275_vm1, %v1594_v0 }
 0xabd   :  { %v1595_v5 = vmul.f32 %v2783_v34, %v1579_v13 }
 0xabf   :  { %2802 = vmatmul.mubr.msk.f32.gmra.mxu1 %vm275_vm1, %v1595_v5 }
 0xac0   :  { %v3611_v14 = vpop.permute.xlu1 %1928 }
 0xac4   :  { %v3613_v18 = vpop.permute.xlu1 %1932 }
 0xac8   :  { %v1966_v19 = vpop.permute.xlu1 %1965 }
 0xac9   :  { %2819 = vmatpush3.bf16.msra.mxu0 %v1966_v19 }
 0xaca   :  { %2820 = vmatprep.subr.bf16.mxu0 %v3011_v3 }
 0xb73   :  { %v2794_v22 = vpop.f32.mrf.mxu1 }
 0xb74   :  { %v1726_v28 = vmul.f32 0.35355338, %v2794_v22 }
 0xb75   :  { %v1686_v24 = vpop.f32.mrf.mxu1 }
 0xb76   :  { %v1725_v9 = vmul.f32 0.35355338, %v1686_v24  ;;  %v1734_v10 = vsel %vm663_vm3, %v1726_v28, -3.4028235e+38 }
 0xb77   :  { %v2797_v25 = vpop.f32.mrf.mxu1 }
 0xb78   :  { %v1728_v26 = vmul.f32 0.35355338, %v2797_v25  ;;  %v1733_v11 = vsel %vm662_vm4, %v1725_v9, -3.4028235e+38 }
 0xb79   :  { %v1696_v15 = vpop.f32.mrf.mxu1 }
 0xb7a   :  { %v1727_v30 = vmul.f32 0.35355338, %v1696_v15  ;;  %v1736_v32 = vsel %vm665_vm2, %v1728_v26, -3.4028235e+38 }
 0xb7b   :  { %v2800_v31 = vpop.f32.mrf.mxu1  ;;  %v1742_v55 = vmax.f32 %v1734_v10, %v1736_v32 }
 0xb7c   :  { %v1730_v40 = vmul.f32 0.35355338, %v2800_v31  ;;  %v1735_v49 = vsel %vm664_vm5, %v1727_v30, -3.4028235e+38 }
 0xb7d   :  { %v1706_v46 = vpop.f32.mrf.mxu1  ;;  %v1741_v12 = vmax.f32 %v1733_v11, %v1735_v49 }
 0xb7e   :  { %v1738_v52 = vsel %vm667_vm6, %v1730_v40, -3.4028235e+38  ;;  %v1729_v54 = vmul.f32 0.35355338, %v1706_v46 }
 0xb7f   :  { %v2803_v53 = vpop.f32.mrf.mxu1  ;;  %v1744_v51 = vmax.f32 %v1742_v55, %v1738_v52 }
 0xb80   :  { %v1732_v56 = vmul.f32 0.35355338, %v2803_v53  ;;  %v1737_v34 = vsel %vm666_vm7, %v1729_v54, -3.4028235e+38 }
 0xb81   :  { %v1716_v35 = vpop.f32.mrf.mxu1  ;;  %v1743_v60 = vmax.f32 %v1741_v12, %v1737_v34 }
 0xb82   :  { %v1740_v17 = vsel %vm669_vm11, %v1732_v56, -3.4028235e+38  ;;  %v1731_v59 = vmul.f32 0.35355338, %v1716_v35 }
 0xb83   :  { %v1746_v50 = vmax.f32 %v1744_v51, %v1740_v17 }
 0xb84   :  { %v1739_v7 = vsel %vm3767_vm0, %v1731_v59, -3.4028235e+38 }
 0xb85   :  { %v1748_v39 = vsub.f32 %v1734_v10, %v1746_v50  ;;  %v1750_v61 = vsub.f32 %v1736_v32, %v1746_v50  ;;  %v1752_v62 = vsub.f32 %v1738_v52, %v1746_v50  ;;  %v1754_v6 = vsub.f32 %v1740_v17, %v1746_v50 }
 0xb86   :  { %v1745_v0 = vmax.f32 %v1743_v60, %v1739_v7 }
 0xb87   :  { %v1757_v58 = vmul.f32 1.442695, %v1748_v39  ;;  %v1761_v13 = vmul.f32 1.442695, %v1750_v61  ;;  %v1765_v21 = vmul.f32 1.442695, %v1752_v62 }
 0xb88   :  { %v1769_v5 = vmul.f32 1.442695, %v1754_v6  ;;  %v1747_v19 = vsub.f32 %v1733_v11, %v1745_v0  ;;  %v1749_v22 = vsub.f32 %v1735_v49, %v1745_v0  ;;  %v1751_v24 = vsub.f32 %v1737_v34, %v1745_v0 }
 0xb89   :  { %2939 = vpow2.f32 %v1757_v58  ;;  %v1753_v33 = vsub.f32 %v1739_v7, %v1745_v0 }
 0xb8a   :  { %2941 = vpow2.f32 %v1761_v13  ;;  %v1755_v25 = vmul.f32 1.442695, %v1747_v19  ;;  %v1759_v26 = vmul.f32 1.442695, %v1749_v22  ;;  %v1763_v38 = vmul.f32 1.442695, %v1751_v24 }
 0xb8b   :  { %2943 = vpow2.f32 %v1765_v21  ;;  %v1767_v15 = vmul.f32 1.442695, %v1753_v33 }
 0xb8c   :  { %2945 = vpow2.f32 %v1769_v5 }
 0xb8d   :  { %2947 = vpow2.f32 %v1755_v25 }
 0xb8e   :  { %2949 = vpow2.f32 %v1759_v26 }
 0xb8f   :  { %2951 = vpow2.f32 %v1763_v38 }
 0xb90   :  { %2953 = vpow2.f32 %v1767_v15 }
 0xb96   :  { %v2940_v28 = vpop.eup %2939 }
 0xb97   :  { %v2942_v30 = vpop.eup %2941 }
 0xb98   :  { %v2944_v31 = vpop.eup %2943  ;;  %v1772_v32 = vadd.f32 %v2942_v30, %v2940_v28 }
 0xb99   :  { %v2946_v40 = vpop.eup %2945 }
 0xb9a   :  { %v2948_v9 = vpop.eup %2947  ;;  %v1774_v46 = vadd.f32 %v2944_v31, %v1772_v32 }
 0xb9b   :  { %v2950_v10 = vpop.eup %2949 }
 0xb9c   :  { %v1776_v52 = vadd.f32 %v2946_v40, %v1774_v46  ;;  %v1771_v54 = vadd.f32 %v2950_v10, %v2948_v9  ;;  %v2952_v55 = vpop.eup %2951 }
 0xb9d   :  { %v2954_v53 = vpop.eup %2953 }
 0xb9e   :  { %v1773_v49 = vadd.f32 %v2952_v55, %v1771_v54  ;;  %2955 = vrcp.f32 %v1776_v52 }
 0xba0   :  { %v1775_v56 = vadd.f32 %v2954_v53, %v1773_v49 }
 0xba2   :  { %2957 = vrcp.f32 %v1775_v56 }
 0xbab   :  { %v2956_v11 = vpop.eup %2955 }
 0xbac   :  { %v1780_v34 = vmul.f32 %v2956_v11, %v2940_v28  ;;  %v1782_v50 = vmul.f32 %v2956_v11, %v2942_v30  ;;  %v1784_v61 = vmul.f32 %v2956_v11, %v2944_v31  ;;  %v1939_v28 = vpop.permute.xlu1 %1938 }
 0xbae   :  { %v1788_v59 = vmul.f32 %v1780_v34, %v3340_v36  ;;  %v1790_v39 = vmul.f32 %v1782_v50, %v3342_v43  ;;  %v1786_v36 = vmul.f32 %v2956_v11, %v2946_v40 }
 0xbaf   :  { %v2958_v51 = vpop.eup %2957 }
 0xbb0   :  { %v1779_v35 = vmul.f32 %v2958_v51, %v2948_v9  ;;  %v1781_v12 = vmul.f32 %v2958_v51, %v2950_v10  ;;  %v1783_v7 = vmul.f32 %v2958_v51, %v2952_v55  ;;  %v1785_v6 = vmul.f32 %v2958_v51, %v2954_v53 }
 0xbb1   :  { %v1794_v0 = vmul.f32 %v1786_v36, %v3360_v63  ;;  %v2903_v36 = vld [vmem:[%s3754_s5 + $0x68] sm:$0xff]  }
 0xbb2   :  { %v1787_v17 = vmul.f32 %v1779_v35, %v3332_v2  ;;  %v1789_v60 = vmul.f32 %v1781_v12, %v3334_v45  ;;  %v1791_v62 = vmul.f32 %v1783_v7, %v3336_v16  ;;  %v1792_v2 = vmul.f32 %v1784_v61, %v3352_v57  ;;  %v1927_v16 = vpop.permute.xlu0 %1926 }
 0xbb3   :  { %v1793_v45 = vmul.f32 %v1785_v6, %v3338_v29  ;;  %v2901_v6 = vld [vmem:[%s3754_s5 + $0x78] sm:$0xff]  }
 0xbb4   :  { %2806 = vmatprep.mubr.msk.f32.mxu1 %vm772_vm15, %v1787_v17 }
 0xbb5   :  { %2807 = vmatmul.mubr.msk.f32.vlgmr.msra.gmra.mxu1 %vm772_vm15, %v1788_v59 }
 0xbb6   :  { %2809 = vmatprep.mubr.msk.f32.mxu1 %vm772_vm15, %v1789_v60  ;;  %v1931_v43 = vpop.permute.xlu0 %1930 }
 0xbb9   :  { %2810 = vmatmul.mubr.msk.f32.gmra.mxu1 %vm772_vm15, %v1790_v39 }
 0xbba   :  { %2812 = vmatprep.mubr.msk.f32.mxu1 %vm772_vm15, %v1791_v62  ;;  %v1935_v58 = vpop.permute.xlu0 %1934  ;;  %v2900_v62 = vld [vmem:[%s3753_s4 + $0x10] sm:$0xff]  }
 0xbbd   :  { %2813 = vmatmul.mubr.msk.f32.gmra.mxu1 %vm772_vm15, %v1792_v2  ;;  %v2902_v2 = vld [vmem:[%s3754_s5 + $0x70] sm:$0xff]  }
 0xbbe   :  { %2815 = vmatprep.mubr.msk.f32.mxu1 %vm772_vm15, %v1793_v45  ;;  %v1937_v13 = vpop.permute.xlu0 %1936  ;;  %v2904_v45 = vld [vmem:[%s3754_s5 + $0x60] sm:$0xff]  }
 0xbc1   :  { %2816 = vmatmul.mubr.msk.f32.gmra.mxu1 %vm772_vm15, %v1794_v0  ;;  %v2905_v0 = vld [vmem:[%s3754_s5 + $0x58] sm:$0xff]  }
 0xbc2   :  { %2830 = vmatprep.mubr.msk.bf16.mxu1 %vm3012_vm12, %v3011_v3  ;;  %v1964_v21 = vpop.permute.xlu0 %1963 }
 0xbc3   :  { %2821 = vmatpush3.bf16.msra.mxu0 %v1964_v21 }
 0xbc4   :  { %2834 = vmatprep.subr.bf16.mxu0 %v3011_v3 }
 0xc75   :  { %v2808_v29 = vpop.f32.mrf.mxu1 }
 0xc76   :  { %v1949_v25 = vmul.f32 %v2808_v29, %v1927_v16 }
 0xc77   :  { %v1885_v57 = vpop.f32.mrf.mxu1 }
 0xc78   :  { %v1948_v26 = vmul.f32 %v3607_v8, %v1885_v57  ;;  %v3694_v57 = vld [vmem:[%s3755_s6 + $0x8] sm:$0xff] }
 0xc79   :  { %v2811_v5 = vpop.f32.mrf.mxu1 }
 0xc7a   :  { %v1951_v24 = vmul.f32 %v2811_v5, %v1931_v43  ;;  %v2038_v5 = vrot.slane %v3694_v57, %v1018_v42  ;;  %v2906_v42 = vld [vmem:[%s3754_s5 + $0x50] sm:$0xff]  }
 0xc7b   :  { %v1895_v19 = vpop.f32.mrf.mxu1 }
 0xc7c   :  { %v1950_v63 = vmul.f32 %v3611_v14, %v1895_v19  ;;  %v1957_v31 = vadd.f32 %v1951_v24, %v1949_v25 }
 0xc7d   :  { %v2814_v22 = vpop.f32.mrf.mxu1 }
 0xc7e   :  { %v1953_v38 = vmul.f32 %v2814_v22, %v1935_v58  ;;  %v1956_v32 = vadd.f32 %v1950_v63, %v1948_v26  ;;  %v2050_v63 = vrot.slane %v3694_v57, %v1030_v48  ;;  %v2907_v48 = vld [vmem:[%s3754_s5 + $0x48] sm:$0xff]  }
 0xc7f   :  { %v1905_v33 = vpop.f32.mrf.mxu1 }
 0xc80   :  { %v1952_v15 = vmul.f32 %v3613_v18, %v1905_v33  ;;  %v1959_v46 = vadd.f32 %v1957_v31, %v1953_v38  ;;  %v2062_v31 = vrot.slane %v3694_v57, %v1041_v4 }
 0xc81   :  { %v2817_v30 = vpop.f32.mrf.mxu1 }
 0xc82   :  { %v1955_v40 = vmul.f32 %v2817_v30, %v1939_v28  ;;  %v1958_v10 = vadd.f32 %v1956_v32, %v1952_v15  ;;  %v2908_v30 = vld [vmem:[%s3754_s5 + $0x40] sm:$0xff]  }
 0xc83   :  { %v1915_v9 = vpop.f32.mrf.mxu1 }
 0xc84   :  { %v1954_v52 = vmul.f32 %v1937_v13, %v1915_v9  ;;  %v1961_v54 = vadd.f32 %v1959_v46, %v1955_v40 }
 0xc86   :  { %v1960_v55 = vadd.f32 %v1958_v10, %v1954_v52 }
 0xc88   :  { %v1962_v49 = vpack.c.bf16 %v1961_v54, %v1960_v55 }
 0xc8a   :  { %2823 = vmatmul.mubr.msk.bf16.vlgmr.msra.gmra.mxu0 %vm275_vm1, %v1962_v49 }
 0xc8b   :  { %2850 = vmatprep.mubr.msk.bf16.mxu0 %vm3012_vm12, %v3011_v3  ;;  %2835 = vmatpush3.bf16.msra.mxu0 %v2901_v6  ;;  %v2910_v6 = vld [vmem:[%s3756_s7] sm:$0xff]  }
 0xc8c   :  { %2836 = vmatprep.subr.bf16.mxu0 %v3011_v3 }
 0xc8f   :  { %2837 = vmatpush3.bf16.msra.mxu0 %v2902_v2 }
 0xc90   :  { %2838 = vmatprep.subr.bf16.mxu0 %v3011_v3 }
 0xc93   :  { %2839 = vmatpush3.bf16.msra.mxu0 %v2903_v36 }
 0xc94   :  { %2840 = vmatprep.subr.bf16.mxu0 %v3011_v3 }
 0xc97   :  { %2841 = vmatpush3.bf16.msra.mxu0 %v2904_v45 }
 0xc98   :  { %2842 = vmatprep.subr.bf16.mxu0 %v3011_v3 }
 0xc9b   :  { %2843 = vmatpush3.bf16.msra.mxu0 %v2905_v0 }
 0xc9c   :  { %2844 = vmatprep.subr.bf16.mxu0 %v3011_v3 }
 0xc9f   :  { %2845 = vmatpush3.bf16.msra.mxu0 %v2906_v42 }
 0xca0   :  { %2846 = vmatprep.subr.bf16.mxu0 %v3011_v3 }
 0xca3   :  { %2847 = vmatpush3.bf16.msra.mxu0 %v2907_v48 }
 0xca4   :  { %2848 = vmatprep.subr.bf16.mxu0 %v3011_v3 }
 0xca7   :  { %2849 = vmatpush3.bf16.msra.mxu0 %v2908_v30 }
 0xd4a   :  { %v2006_v8 = vpop.f32.mrf.mxu0 }
 0xd4b   :  { %v2013_v14 = vadd.f32 %v2006_v8, %v3460_v41  ;;  %v2142_v8 = vrot.slane %v3694_v57, %v1120_v27 }
 0xd4c   :  { %v2824_v18 = vpop.f32.mrf.mxu0 }
 0xd4d   :  { %v2015_v53 = vsel %vm275_vm1, %v2013_v14, 0.0 }
 0xd4e   :  { %2016 = vadd.xlane.f32.xlu1 %v2015_v53  ;;  %v2009_v56 = vpop.f32.mrf.mxu0 }
 0xd4f   :  { %v2014_v11 = vadd.f32 %v2009_v56, %v3463_v47  ;;  %v2899_v47 = vld [vmem:[%s3753_s4 + $0x18] sm:$0xff]  }
 0xd50   :  { %v2825_v51 = vpop.f32.mrf.mxu0  ;;  %2827 = vmatpush3.bf16.msra.mxu1 %v2899_v47 }
 0xd51   :  { %v2018_v34 = vsel %vm275_vm1, %v2014_v11, 0.0  ;;  %2828 = vmatprep.subr.bf16.mxu1 %v3011_v3 }
 0xd52   :  { %2019 = vadd.xlane.f32.xlu0 %v2018_v34 }
 0xd54   :  { %2829 = vmatpush3.bf16.msra.mxu1 %v2900_v62  ;;  %v2909_v62 = vld [vmem:[%s3756_s7 + $0x8] sm:$0xff]  }
 0xd55   :  { %2854 = vmatprep.subr.bf16.mxu1 %v3011_v3 }
 0xdd7   :  { %v2017_v35 = vpop.xlane.xlu1 %2016 }
 0xdd8   :  { %v2021_v12 = vmul.f32 0.03125, %v2017_v35 }
 0xdda   :  { %v2023_v17 = vsub.f32 %v2013_v14, %v2021_v12 }
 0xddb   :  { %v2020_v59 = vpop.xlane.xlu0 %2019 }
 0xddc   :  { %v2022_v50 = vmul.f32 0.03125, %v2020_v59  ;;  %v2025_v60 = vmul.f32 %v2023_v17, %v2023_v17  ;;  %v2039_v22 = vmul.f32 %v2038_v5, %v2023_v17 }
 0xdde   :  { %v2024_v7 = vsub.f32 %v2014_v11, %v2022_v50  ;;  %v2027_v41 = vsel %vm275_vm1, %v2025_v60, 0.0 }
 0xddf   :  { %2028 = vadd.xlane.f32.xlu0 %v2027_v41 }
 0xde0   :  { %v2026_v39 = vmul.f32 %v2024_v7, %v2024_v7  ;;  %v2040_v24 = vmul.f32 %v2038_v5, %v2024_v7 }
 0xde2   :  { %v2030_v61 = vsel %vm275_vm1, %v2026_v39, 0.0 }
 0xde3   :  { %2031 = vadd.xlane.f32.xlu1 %v2030_v61 }
 0xe68   :  { %v2029_v16 = vpop.xlane.xlu0 %2028 }
 0xe69   :  { %v2033_v43 = vmul.f32 0.03125, %v2029_v16 }
 0xe6b   :  { %v2041_v58 = vadd.f32 1e-06, %v2033_v43 }
 0xe6c   :  { %v2032_v13 = vpop.xlane.xlu1 %2031 }
 0xe6d   :  { %2959 = vrsqrt.f32 %v2041_v58  ;;  %v2034_v21 = vmul.f32 0.03125, %v2032_v13  ;;  %v2257_v58 = vrot.slane %v3694_v57, %v1235_v20  ;;  %v2269_v13 = vrot.slane %v3694_v57, %v1247_v23  ;;  %v2983_v23 = vld [vmem:[%s3755_s6] sm:$0xff]  ;;  %s3014_s6 = smov [#allocation2]  }
 0xe6e   :  { %v2281_v20 = vsub.s32 6, %v3152_v44  ;;  %s2368_s11 = sshll.u32 %s3014_s6, 4  ;;  %s2369_s11 = int_to_ptr.vmem [resolvable:$true] %s2368_s11 }
 0xe6f   :  { %v2042_v29 = vadd.f32 1e-06, %v2034_v21  ;;  %s2984_s0 = scalar_lea.vmem %s2369_s11, 256  ;;  %p2989_p1 = scmp.lt.s32.totalorder %s2369_s11, %s2369_s11 }
 0xe70   :  { %v2282_v57 = vrot.slane %v2983_v23, %v2281_v20  ;;  %p2985_p0 = scmp.ne.s32.totalorder %s2369_s11, %s2984_s0  ;;  %p2990_p2 = scmp.lt.s32.totalorder %s2984_s0, %s2984_s0 }
 0xe71   :  { %2961 = vrsqrt.f32 %v2042_v29 }
 0xe72   :  { %p2991_p3 = por %p2990_p2, %p2989_p1 }
 0xe74   :  { %p2992_p4 = pnand %p2991_p3, %p2985_p0 }
 0xe7a   :  { %v2960_v19 = vpop.eup %2959 }
 0xe7b   :  { %v2045_v33 = vmul.f32 %v2960_v19, %v2039_v22 }
 0xe7d   :  { %v2051_v38 = vadd.f32 %v2050_v63, %v2045_v33 }
 0xe7e   :  { %v2962_v25 = vpop.eup %2961 }
 0xe7f   :  { %v2046_v26 = vmul.f32 %v2962_v25, %v2040_v24 }
 0xe81   :  { %v2052_v15 = vadd.f32 %v2050_v63, %v2046_v26 }
 0xe83   :  { %v2053_v28 = vpack.c.bf16 %v2052_v15, %v2051_v38 }
 0xe85   :  { %2831 = vmatmul.mubr.msk.bf16.vlgmr.msra.gmra.mxu1 %vm275_vm1, %v2053_v28 }
 0xe86   :  { %2858 = vmatprep.mubr.msk.bf16.mxu1 %vm3012_vm12, %v3011_v3  ;;  %2855 = vmatpush3.bf16.msra.mxu1 %v2909_v62 }
 0xe87   :  { %2856 = vmatprep.subr.bf16.mxu1 %v3011_v3 }
 0xe8a   :  { %2857 = vmatpush3.bf16.msra.mxu1 %v2910_v6 }
 0xf45   :  { %v2112_v32 = vpop.f32.mrf.mxu1 }
 0xf46   :  { %v2113_v9 = vadd.f32 %v2112_v32, %v2062_v31 }
 0xf47   :  { %v2832_v40 = vpop.f32.mrf.mxu1 }
 0xf48   :  { %v2119_v54 = vmax.f32 %v2113_v9, 0.0 }
 0xf49   :  { %v2115_v46 = vpop.f32.mrf.mxu1 }
 0xf4a   :  { %v2116_v10 = vadd.f32 %v2115_v46, %v2062_v31 }
 0xf4b   :  { %v2833_v52 = vpop.f32.mrf.mxu1 }
 0xf4c   :  { %v2120_v55 = vmax.f32 %v2116_v10, 0.0 }
 0xf4e   :  { %v2121_v49 = vpack.c.bf16 %v2120_v55, %v2119_v54 }
 0xf50   :  { %2851 = vmatmul.mubr.bf16.vlgmr.msra.gmra.mxu0 %v2121_v49 }
0x1010   :  { %v2225_v14 = vpop.f32.mrf.mxu0 }
0x1011   :  { %v2226_v18 = vadd.f32 %v2225_v14, %v2142_v8 }
0x1012   :  { %v2852_v53 = vpop.f32.mrf.mxu0 }
0x1013   :  { %v2232_v56 = vadd.f32 %v2226_v18, %v2051_v38 }
0x1014   :  { %v2228_v11 = vpop.f32.mrf.mxu0 }
0x1015   :  { %v2229_v4 = vadd.f32 %v2228_v11, %v2142_v8  ;;  %v2234_v51 = vsel %vm275_vm1, %v2232_v56, 0.0 }
0x1016   :  { %2235 = vadd.xlane.f32.xlu0 %v2234_v51  ;;  %v2853_v34 = vpop.f32.mrf.mxu0 }
0x1017   :  { %v2233_v35 = vadd.f32 %v2229_v4, %v2052_v15 }
0x1019   :  { %v2237_v12 = vsel %vm275_vm1, %v2233_v35, 0.0 }
0x101a   :  { %2238 = vadd.xlane.f32.xlu1 %v2237_v12 }
0x109f   :  { %v2236_v17 = vpop.xlane.xlu0 %2235 }
0x10a0   :  { %v2240_v59 = vmul.f32 0.03125, %v2236_v17 }
0x10a2   :  { %v2242_v50 = vsub.f32 %v2232_v56, %v2240_v59 }
0x10a3   :  { %v2239_v60 = vpop.xlane.xlu1 %2238 }
0x10a4   :  { %v2241_v7 = vmul.f32 0.03125, %v2239_v60  ;;  %v2244_v27 = vmul.f32 %v2242_v50, %v2242_v50  ;;  %v2258_v21 = vmul.f32 %v2257_v58, %v2242_v50 }
0x10a6   :  { %v2243_v41 = vsub.f32 %v2233_v35, %v2241_v7  ;;  %v2246_v39 = vsel %vm275_vm1, %v2244_v27, 0.0 }
0x10a7   :  { %2247 = vadd.xlane.f32.xlu0 %v2246_v39 }
0x10a8   :  { %v2245_v61 = vmul.f32 %v2243_v41, %v2243_v41  ;;  %v2259_v5 = vmul.f32 %v2257_v58, %v2243_v41 }
0x10aa   :  { %v2249_v47 = vsel %vm275_vm1, %v2245_v61, 0.0 }
0x10ab   :  { %2250 = vadd.xlane.f32.xlu1 %v2249_v47 }
0x1130   :  { %v2248_v2 = vpop.xlane.xlu0 %2247 }
0x1131   :  { %v2252_v36 = vmul.f32 0.03125, %v2248_v2 }
0x1133   :  { %v2260_v45 = vadd.f32 1e-06, %v2252_v36 }
0x1134   :  { %v2251_v0 = vpop.xlane.xlu1 %2250 }
0x1135   :  { %2963 = vrsqrt.f32 %v2260_v45  ;;  %v2253_v16 = vmul.f32 0.03125, %v2251_v0 }
0x1137   :  { %v2261_v43 = vadd.f32 1e-06, %v2253_v16 }
0x1139   :  { %2965 = vrsqrt.f32 %v2261_v43 }
0x1142   :  { %v2964_v29 = vpop.eup %2963 }
0x1143   :  { %v2264_v3 = vmul.f32 %v2964_v29, %v2258_v21 }
0x1145   :  { %v2270_v19 = vadd.f32 %v2269_v13, %v2264_v3 }
0x1146   :  { %v2966_v22 = vpop.eup %2965 }
0x1147   :  { %v2265_v24 = vmul.f32 %v2966_v22, %v2259_v5  ;;  %v2272_v33 = vmul.f32 %v2270_v19, %v3455_v1 }
0x1149   :  { %v2271_v63 = vadd.f32 %v2269_v13, %v2265_v24 }
0x114b   :  { %v2273_v25 = vmul.f32 %v2271_v63, %v3457_v37 }
0x114d   :  { %v2274_v26 = vpack.c.bf16 %v2273_v25, %v2272_v33 }
0x114f   :  { %2859 = vmatmul.mubr.msk.bf16.vlgmr.msra.gmra.mxu1 %vm275_vm1, %v2274_v26 }
0x120f   :  { %v2332_v38 = vpop.f32.mrf.mxu1 }
0x1210   :  { %v2333_v15 = vadd.f32 %v2332_v38, %v2282_v57 }
0x1211   :  { %v2860_v28 = vpop.f32.mrf.mxu1 }
0x1212   :  { %2339 = vmax.xlane.f32.xlu0 %v2333_v15 }
0x1213   :  { %v2335_v42 = vpop.f32.mrf.mxu1 }
0x1214   :  { %v2336_v48 = vadd.f32 %v2335_v42, %v2282_v57 }
0x1215   :  { %v2861_v30 = vpop.f32.mrf.mxu1 }
0x1216   :  { %2341 = vmax.xlane.f32.xlu1 %v2336_v48 }
0x129b   :  { %v2340_v1 = vpop.xlane.xlu0 %2339 }
0x129c   :  { %v2343_v37 = vsub.f32 %v2333_v15, %v2340_v1 }
0x129e   :  { %v2345_v31 = vmul.f32 1.442695, %v2343_v37 }
0x129f   :  { %v2342_v32 = vpop.xlane.xlu1 %2341 }
0x12a0   :  { %2967 = vpow2.f32 %v2345_v31  ;;  %v2344_v40 = vsub.f32 %v2336_v48, %v2342_v32 }
0x12a2   :  { %v2347_v44 = vmul.f32 1.442695, %v2344_v40 }
0x12a4   :  { %2969 = vpow2.f32 %v2347_v44 }
0x12ad   :  { %v2968_v9 = vpop.eup %2967 }
0x12ae   :  { %2349 = vadd.xlane.f32.xlu0 %v2968_v9 }
0x12b1   :  { %v2970_v46 = vpop.eup %2969 }
0x12b2   :  { %2351 = vadd.xlane.f32.xlu1 %v2970_v46 }
0x1337   :  { %v2350_v10 = vpop.xlane.xlu0 %2349 }
0x1338   :  { %2971 = vlog2.f32 %v2350_v10 }
0x133b   :  { %v2352_v52 = vpop.xlane.xlu1 %2351 }
0x133c   :  { %2973 = vlog2.f32 %v2352_v52 }
0x1345   :  { %v2972_v54 = vpop.eup %2971 }
0x1346   :  { %v2354_v55 = vmul.f32 0.6931472, %v2972_v54 }
0x1348   :  { %v2357_v49 = vadd.f32 %v2354_v55, %v2340_v1 }
0x1349   :  { %v2974_v8 = vpop.eup %2973 }
0x134a   :  { %v2359_v14 = vsub.f32 %v2333_v15, %v2357_v49  ;;  %v2356_v18 = vmul.f32 0.6931472, %v2974_v8 }
0x134c   :  { %2361 = vst [vmem:[#allocation2] sm:$0xff] %v2359_v14  ;;  %v2358_v53 = vadd.f32 %v2356_v18, %v2342_v32 }
0x134e   :  { %v2360_v56 = vsub.f32 %v2336_v48, %v2358_v53 }
0x1350   :  { %2362 = vst [vmem:[#allocation2 + $0x8] sm:$0xff] %v2360_v56 }
0x1351   :  { %2995 = shalt.err (!%p2992_p4)
}
0x1352   :  { %s3015_s29 = smov 128   ;;  %s3016_s20 = smov 8  }
0x1353   :  { %2374 = dma.vmem_to_hbm [thread:$0]  %s2369_s11, 256, %s3757_s8, [#allocation3], %s3015_s29, %s3015_s29, %s3016_s20  }
0x1354   :  { %3004 = dma.done.wait [#allocation3], 256  }
0x1355   :  { %3005 = vsyncadd [#allocation3], 4294967040 }
0x1356   :  { %2378 = vsyncpa [#allocation3], 1 }

</bundles_post_ra>
